<compile_context>
chip_gen: v7x
topology: tpu7x:2x2x1
jax: 0.10.0
libtpu: 0.0.40
codegen_flags: <defaults>
</compile_context>

<pallas_src>
import jax
import jax.numpy as jnp
from jax.experimental import pallas as pl
from jax.experimental.pallas import tpu as pltpu


def _lstm_recurrence_kernel(gx_ref, whh_ref, y_ref, h_out_ref, c_out_ref):
    """LSTM recurrence for one layer, whole sequence in a single invocation.

    gx_ref : (S, 4, B, H) f32  precomputed x_t @ W_ih^T + (b_ih + b_hh), gate-major
    whh_ref: (4, H, H)    f32  per-gate recurrent weights (W_hh^T split by gate)
    y_ref  : (S, B, H)         per-step hidden outputs (input to next layer)
    h_out_ref, c_out_ref: (B, H) final hidden / cell state
    """
    S = y_ref.shape[0]
    B, H = h_out_ref.shape

    # Hoist the (constant) recurrent weights out of the time loop.
    w_i = whh_ref[0]
    w_f = whh_ref[1]
    w_g = whh_ref[2]
    w_o = whh_ref[3]

    def step(t, carry):
        h, c = carry
        gx = gx_ref[t]  # (4, B, H): leading-axis gate slices are free views.
        i_g = jax.nn.sigmoid(
            gx[0] + jnp.dot(h, w_i, preferred_element_type=jnp.float32))
        f_g = jax.nn.sigmoid(
            gx[1] + jnp.dot(h, w_f, preferred_element_type=jnp.float32))
        g_g = jnp.tanh(
            gx[2] + jnp.dot(h, w_g, preferred_element_type=jnp.float32))
        o_g = jax.nn.sigmoid(
            gx[3] + jnp.dot(h, w_o, preferred_element_type=jnp.float32))
        c_new = f_g * c + i_g * g_g
        h_new = o_g * jnp.tanh(c_new)
        y_ref[t] = h_new.astype(y_ref.dtype)
        return h_new, c_new

    h0 = jnp.zeros((B, H), jnp.float32)
    c0 = jnp.zeros((B, H), jnp.float32)
    h_n, c_n = jax.lax.fori_loop(0, S, step, (h0, c0), unroll=True)

    h_out_ref[...] = h_n.astype(h_out_ref.dtype)
    c_out_ref[...] = c_n.astype(c_out_ref.dtype)


def lstm_layer(x, w_ih_t, w_hh_t, bias):
    """One LSTM layer.

    x      : (S, B, D_in) f32
    w_ih_t : (D_in, 4H) f32, gate-major columns (i|f|g|o)
    w_hh_t : (H, 4H)    f32, gate-major columns
    bias   : (4H,)      f32  (b_ih + b_hh)
    Returns y (S, B, H), h_n (B, H), c_n (B, H).
    """
    S, B, D = x.shape
    H = w_hh_t.shape[0]

    # Hoisted input projection: one well-shaped matmul, off the serial path,
    # with the bias folded in once.  Laid out (S, 4, B, H) gate-major.
    gx = (jnp.dot(x.reshape(S * B, D), w_ih_t,
                  precision=jax.lax.Precision.HIGHEST) + bias)       # (S*B, 4H)
    gx = gx.reshape(S, B, 4, H).transpose(0, 2, 1, 3)                # (S, 4, B, H)

    # Per-gate recurrent weights (4, H, H) so the kernel never slices lanes.
    w_hh_g = jnp.transpose(w_hh_t.reshape(H, 4, H), (1, 0, 2))

    y, h_n, c_n = pl.pallas_call(
        _lstm_recurrence_kernel,
        out_shape=(
            jax.ShapeDtypeStruct((S, B, H), jnp.float32),
            jax.ShapeDtypeStruct((B, H), jnp.float32),
            jax.ShapeDtypeStruct((B, H), jnp.float32),
        ),
        in_specs=[
            pl.BlockSpec(memory_space=pltpu.MemorySpace.VMEM),
            pl.BlockSpec(memory_space=pltpu.MemorySpace.VMEM),
        ],
        out_specs=(
            pl.BlockSpec(memory_space=pltpu.MemorySpace.VMEM),
            pl.BlockSpec(memory_space=pltpu.MemorySpace.VMEM),
            pl.BlockSpec(memory_space=pltpu.MemorySpace.VMEM),
        ),
    )(gx, w_hh_g)
    return y, h_n, c_n


def encoder_forward(src, params):
    """src: (S, B) int32 token ids.  Returns (hidden, cell): (L, B, H) each."""
    emb = jnp.take(params["embedding"], src, axis=0)  # (S, B, E)  (glue)
    x = emb                                           # dropout: identity (eval)
    hiddens, cells = [], []
    for layer in params["lstm"]:
        x, h_n, c_n = lstm_layer(x, layer["w_ih_t"], layer["w_hh_t"],
                                 layer["bias"])
        hiddens.append(h_n)
        cells.append(c_n)
    return jnp.stack(hiddens, axis=0), jnp.stack(cells, axis=0)


def init_params(key, input_dim, embedding_dim, hidden_dim, num_layers):
    keys = jax.random.split(key, 1 + 4 * num_layers)
    params = {"embedding": jax.random.normal(
        keys[0], (input_dim, embedding_dim), jnp.float32) * 0.1}
    layers = []
    for l in range(num_layers):
        in_dim = embedding_dim if l == 0 else hidden_dim
        k = keys[1 + 4 * l: 1 + 4 * (l + 1)]
        scale = 1.0 / jnp.sqrt(hidden_dim)
        # PyTorch stores (4H, in); we pre-transpose to (in, 4H). Gate order i,f,g,o.
        w_ih_t = (jax.random.uniform(k[0], (in_dim, 4 * hidden_dim),
                                     jnp.float32, -1, 1) * scale)
        w_hh_t = (jax.random.uniform(k[1], (hidden_dim, 4 * hidden_dim),
                                     jnp.float32, -1, 1) * scale)
        b_ih = jax.random.uniform(k[2], (4 * hidden_dim,), jnp.float32, -1, 1) * scale
        b_hh = jax.random.uniform(k[3], (4 * hidden_dim,), jnp.float32, -1, 1) * scale
        layers.append({"w_ih_t": w_ih_t, "w_hh_t": w_hh_t,
                       "bias": b_ih + b_hh})
        params["lstm"] = layers
    return params


def encoder_forward_ref(src, params):
    """Pure-JAX reference (lax.scan) for correctness checking."""
    emb = jnp.take(params["embedding"], src, axis=0)
    x = emb
    hiddens, cells = [], []
    for layer in params["lstm"]:
        B = x.shape[1]
        H = layer["w_hh_t"].shape[0]

        def step(carry, x_t, layer=layer, H=H):
            h, c = carry
            gates = (jnp.dot(x_t, layer["w_ih_t"],
                             precision=jax.lax.Precision.HIGHEST)
                     + jnp.dot(h, layer["w_hh_t"],
                               precision=jax.lax.Precision.HIGHEST)
                     + layer["bias"])
            i_g = jax.nn.sigmoid(gates[:, 0 * H:1 * H])
            f_g = jax.nn.sigmoid(gates[:, 1 * H:2 * H])
            g_g = jnp.tanh(gates[:, 2 * H:3 * H])
            o_g = jax.nn.sigmoid(gates[:, 3 * H:4 * H])
            c_new = f_g * c + i_g * g_g
            h_new = o_g * jnp.tanh(c_new)
            return (h_new, c_new), h_new

        init = (jnp.zeros((B, H), jnp.float32), jnp.zeros((B, H), jnp.float32))
        (h_n, c_n), y = jax.lax.scan(step, init, x)
        x = y
        hiddens.append(h_n)
        cells.append(c_n)
    return jnp.stack(hiddens, axis=0), jnp.stack(cells, axis=0)


if __name__ == "__main__":
    INPUT_DIM = 50        # vocab size
    EMBEDDING_DIM = 32
    HIDDEN_DIM = 32
    NUM_LAYERS = 2
    SEQ_LEN = 8
    BATCH = 2

    key = jax.random.PRNGKey(0)
    k_param, k_src = jax.random.split(key)
    params = init_params(k_param, INPUT_DIM, EMBEDDING_DIM, HIDDEN_DIM, NUM_LAYERS)
    src = jax.random.randint(k_src, (SEQ_LEN, BATCH), 0, INPUT_DIM, jnp.int32)

    hidden, cell = encoder_forward(src, params)
    hidden, cell = jax.block_until_ready(hidden), jax.block_until_ready(cell)

    hidden_ref, cell_ref = encoder_forward_ref(src, params)
    assert hidden.shape == (NUM_LAYERS, BATCH, HIDDEN_DIM)
    assert cell.shape == (NUM_LAYERS, BATCH, HIDDEN_DIM)
    assert jnp.allclose(hidden, hidden_ref, atol=1e-5, rtol=1e-5)
    assert jnp.allclose(cell, cell_ref, atol=1e-5, rtol=1e-5)

    print("KERNEL_OK")
</pallas_src>

<mosaic_0001>
module attributes {stable_mosaic.version = 11 : i64} {
  func.func @_lstm_recurrence_kernel(%arg0: memref<8x4x2x32xf32, #tpu.memory_space<vmem>>, %arg1: memref<4x32x32xf32, #tpu.memory_space<vmem>>, %arg2: memref<8x2x32xf32, #tpu.memory_space<vmem>>, %arg3: memref<2x32xf32, #tpu.memory_space<vmem>>, %arg4: memref<2x32xf32, #tpu.memory_space<vmem>>) attributes {dimension_semantics = [], scalar_prefetch = 0 : i64, scratch_operands = 0 : i64, tpu.core_type = #tpu.core_type<tc>} {
    %c0 = arith.constant 0 : index
    %c0_0 = arith.constant 0 : index
    %c0_1 = arith.constant 0 : index
    %0 = vector.load %arg1[%c0, %c0_0, %c0_1] : memref<4x32x32xf32, #tpu.memory_space<vmem>>, vector<1x32x32xf32>
    %1 = vector.shape_cast %0 : vector<1x32x32xf32> to vector<32x32xf32>
    %c1 = arith.constant 1 : index
    %c0_2 = arith.constant 0 : index
    %c0_3 = arith.constant 0 : index
    %2 = vector.load %arg1[%c1, %c0_2, %c0_3] : memref<4x32x32xf32, #tpu.memory_space<vmem>>, vector<1x32x32xf32>
    %3 = vector.shape_cast %2 : vector<1x32x32xf32> to vector<32x32xf32>
    %c2 = arith.constant 2 : index
    %c0_4 = arith.constant 0 : index
    %c0_5 = arith.constant 0 : index
    %4 = vector.load %arg1[%c2, %c0_4, %c0_5] : memref<4x32x32xf32, #tpu.memory_space<vmem>>, vector<1x32x32xf32>
    %5 = vector.shape_cast %4 : vector<1x32x32xf32> to vector<32x32xf32>
    %c3 = arith.constant 3 : index
    %c0_6 = arith.constant 0 : index
    %c0_7 = arith.constant 0 : index
    %6 = vector.load %arg1[%c3, %c0_6, %c0_7] : memref<4x32x32xf32, #tpu.memory_space<vmem>>, vector<1x32x32xf32>
    %7 = vector.shape_cast %6 : vector<1x32x32xf32> to vector<32x32xf32>
    %cst = arith.constant 0.000000e+00 : f32
    %8 = vector.broadcast %cst : f32 to vector<2x32xf32>
    %cst_8 = arith.constant 0.000000e+00 : f32
    %9 = vector.broadcast %cst_8 : f32 to vector<2x32xf32>
    %c0_i32 = arith.constant 0 : i32
    %10 = arith.index_cast %c0_i32 : i32 to index
    %c0_9 = arith.constant 0 : index
    %c0_10 = arith.constant 0 : index
    %c0_11 = arith.constant 0 : index
    %11 = vector.load %arg0[%10, %c0_9, %c0_10, %c0_11] : memref<8x4x2x32xf32, #tpu.memory_space<vmem>>, vector<1x4x2x32xf32>
    %12 = vector.shape_cast %11 : vector<1x4x2x32xf32> to vector<4x2x32xf32>
    %13 = vector.extract_strided_slice %12 {offsets = [0, 0, 0], sizes = [1, 2, 32], strides = [1, 1, 1]} : vector<4x2x32xf32> to vector<1x2x32xf32>
    %14 = vector.shape_cast %13 : vector<1x2x32xf32> to vector<2x32xf32>
    %cst_12 = arith.constant dense<0.000000e+00> : vector<2x32xf32>
    %15 = tpu.matmul %8, %1, %cst_12 {dimension_numbers = #tpu.dot_dimension_numbers<[1], [0], [0], [1], [0, 0, 1, 1], [], []>} : vector<2x32xf32>, vector<32x32xf32>, vector<2x32xf32> -> vector<2x32xf32>
    %16 = arith.addf %14, %15 : vector<2x32xf32>
    %17 = arith.negf %16 : vector<2x32xf32>
    %18 = math.exp %17 : vector<2x32xf32>
    %cst_13 = arith.constant 1.000000e+00 : f32
    %19 = vector.broadcast %cst_13 : f32 to vector<2x32xf32>
    %20 = arith.addf %19, %18 : vector<2x32xf32>
    %21 = arith.divf %19, %20 : vector<2x32xf32>
    %22 = vector.extract_strided_slice %12 {offsets = [1, 0, 0], sizes = [1, 2, 32], strides = [1, 1, 1]} : vector<4x2x32xf32> to vector<1x2x32xf32>
    %23 = vector.shape_cast %22 : vector<1x2x32xf32> to vector<2x32xf32>
    %cst_14 = arith.constant dense<0.000000e+00> : vector<2x32xf32>
    %24 = tpu.matmul %8, %3, %cst_14 {dimension_numbers = #tpu.dot_dimension_numbers<[1], [0], [0], [1], [0, 0, 1, 1], [], []>} : vector<2x32xf32>, vector<32x32xf32>, vector<2x32xf32> -> vector<2x32xf32>
    %25 = arith.addf %23, %24 : vector<2x32xf32>
    %26 = arith.negf %25 : vector<2x32xf32>
    %27 = math.exp %26 : vector<2x32xf32>
    %cst_15 = arith.constant 1.000000e+00 : f32
    %28 = vector.broadcast %cst_15 : f32 to vector<2x32xf32>
    %29 = arith.addf %28, %27 : vector<2x32xf32>
    %30 = arith.divf %28, %29 : vector<2x32xf32>
    %31 = vector.extract_strided_slice %12 {offsets = [2, 0, 0], sizes = [1, 2, 32], strides = [1, 1, 1]} : vector<4x2x32xf32> to vector<1x2x32xf32>
    %32 = vector.shape_cast %31 : vector<1x2x32xf32> to vector<2x32xf32>
    %cst_16 = arith.constant dense<0.000000e+00> : vector<2x32xf32>
    %33 = tpu.matmul %8, %5, %cst_16 {dimension_numbers = #tpu.dot_dimension_numbers<[1], [0], [0], [1], [0, 0, 1, 1], [], []>} : vector<2x32xf32>, vector<32x32xf32>, vector<2x32xf32> -> vector<2x32xf32>
    %34 = arith.addf %32, %33 : vector<2x32xf32>
    %35 = math.tanh %34 : vector<2x32xf32>
    %36 = vector.extract_strided_slice %12 {offsets = [3, 0, 0], sizes = [1, 2, 32], strides = [1, 1, 1]} : vector<4x2x32xf32> to vector<1x2x32xf32>
    %37 = vector.shape_cast %36 : vector<1x2x32xf32> to vector<2x32xf32>
    %cst_17 = arith.constant dense<0.000000e+00> : vector<2x32xf32>
    %38 = tpu.matmul %8, %7, %cst_17 {dimension_numbers = #tpu.dot_dimension_numbers<[1], [0], [0], [1], [0, 0, 1, 1], [], []>} : vector<2x32xf32>, vector<32x32xf32>, vector<2x32xf32> -> vector<2x32xf32>
    %39 = arith.addf %37, %38 : vector<2x32xf32>
    %40 = arith.negf %39 : vector<2x32xf32>
    %41 = math.exp %40 : vector<2x32xf32>
    %cst_18 = arith.constant 1.000000e+00 : f32
    %42 = vector.broadcast %cst_18 : f32 to vector<2x32xf32>
    %43 = arith.addf %42, %41 : vector<2x32xf32>
    %44 = arith.divf %42, %43 : vector<2x32xf32>
    %45 = arith.mulf %30, %9 : vector<2x32xf32>
    %46 = arith.mulf %21, %35 : vector<2x32xf32>
    %47 = arith.addf %45, %46 : vector<2x32xf32>
    %48 = math.tanh %47 : vector<2x32xf32>
    %49 = arith.mulf %44, %48 : vector<2x32xf32>
    %50 = arith.index_cast %c0_i32 : i32 to index
    %c0_19 = arith.constant 0 : index
    %c0_20 = arith.constant 0 : index
    %51 = vector.load %arg2[%50, %c0_19, %c0_20] : memref<8x2x32xf32, #tpu.memory_space<vmem>>, vector<1x2x32xf32>
    %52 = vector.shape_cast %51 : vector<1x2x32xf32> to vector<2x32xf32>
    %53 = vector.shape_cast %49 : vector<2x32xf32> to vector<1x2x32xf32>
    tpu.vector_store %arg2[%50, %c0_19, %c0_20], %53 {strides = array<i32>} : memref<8x2x32xf32, #tpu.memory_space<vmem>>, vector<1x2x32xf32>,
    %c1_i32 = arith.constant 1 : i32
    %54 = arith.index_cast %c1_i32 : i32 to index
    %c0_21 = arith.constant 0 : index
    %c0_22 = arith.constant 0 : index
    %c0_23 = arith.constant 0 : index
    %55 = vector.load %arg0[%54, %c0_21, %c0_22, %c0_23] : memref<8x4x2x32xf32, #tpu.memory_space<vmem>>, vector<1x4x2x32xf32>
    %56 = vector.shape_cast %55 : vector<1x4x2x32xf32> to vector<4x2x32xf32>
    %57 = vector.extract_strided_slice %56 {offsets = [0, 0, 0], sizes = [1, 2, 32], strides = [1, 1, 1]} : vector<4x2x32xf32> to vector<1x2x32xf32>
    %58 = vector.shape_cast %57 : vector<1x2x32xf32> to vector<2x32xf32>
    %cst_24 = arith.constant dense<0.000000e+00> : vector<2x32xf32>
    %59 = tpu.matmul %49, %1, %cst_24 {dimension_numbers = #tpu.dot_dimension_numbers<[1], [0], [0], [1], [0, 0, 1, 1], [], []>} : vector<2x32xf32>, vector<32x32xf32>, vector<2x32xf32> -> vector<2x32xf32>
    %60 = arith.addf %58, %59 : vector<2x32xf32>
    %61 = arith.negf %60 : vector<2x32xf32>
    %62 = math.exp %61 : vector<2x32xf32>
    %cst_25 = arith.constant 1.000000e+00 : f32
    %63 = vector.broadcast %cst_25 : f32 to vector<2x32xf32>
    %64 = arith.addf %63, %62 : vector<2x32xf32>
    %65 = arith.divf %63, %64 : vector<2x32xf32>
    %66 = vector.extract_strided_slice %56 {offsets = [1, 0, 0], sizes = [1, 2, 32], strides = [1, 1, 1]} : vector<4x2x32xf32> to vector<1x2x32xf32>
    %67 = vector.shape_cast %66 : vector<1x2x32xf32> to vector<2x32xf32>
    %cst_26 = arith.constant dense<0.000000e+00> : vector<2x32xf32>
    %68 = tpu.matmul %49, %3, %cst_26 {dimension_numbers = #tpu.dot_dimension_numbers<[1], [0], [0], [1], [0, 0, 1, 1], [], []>} : vector<2x32xf32>, vector<32x32xf32>, vector<2x32xf32> -> vector<2x32xf32>
    %69 = arith.addf %67, %68 : vector<2x32xf32>
    %70 = arith.negf %69 : vector<2x32xf32>
    %71 = math.exp %70 : vector<2x32xf32>
    %cst_27 = arith.constant 1.000000e+00 : f32
    %72 = vector.broadcast %cst_27 : f32 to vector<2x32xf32>
    %73 = arith.addf %72, %71 : vector<2x32xf32>
    %74 = arith.divf %72, %73 : vector<2x32xf32>
    %75 = vector.extract_strided_slice %56 {offsets = [2, 0, 0], sizes = [1, 2, 32], strides = [1, 1, 1]} : vector<4x2x32xf32> to vector<1x2x32xf32>
    %76 = vector.shape_cast %75 : vector<1x2x32xf32> to vector<2x32xf32>
    %cst_28 = arith.constant dense<0.000000e+00> : vector<2x32xf32>
    %77 = tpu.matmul %49, %5, %cst_28 {dimension_numbers = #tpu.dot_dimension_numbers<[1], [0], [0], [1], [0, 0, 1, 1], [], []>} : vector<2x32xf32>, vector<32x32xf32>, vector<2x32xf32> -> vector<2x32xf32>
    %78 = arith.addf %76, %77 : vector<2x32xf32>
    %79 = math.tanh %78 : vector<2x32xf32>
    %80 = vector.extract_strided_slice %56 {offsets = [3, 0, 0], sizes = [1, 2, 32], strides = [1, 1, 1]} : vector<4x2x32xf32> to vector<1x2x32xf32>
    %81 = vector.shape_cast %80 : vector<1x2x32xf32> to vector<2x32xf32>
    %cst_29 = arith.constant dense<0.000000e+00> : vector<2x32xf32>
    %82 = tpu.matmul %49, %7, %cst_29 {dimension_numbers = #tpu.dot_dimension_numbers<[1], [0], [0], [1], [0, 0, 1, 1], [], []>} : vector<2x32xf32>, vector<32x32xf32>, vector<2x32xf32> -> vector<2x32xf32>
    %83 = arith.addf %81, %82 : vector<2x32xf32>
    %84 = arith.negf %83 : vector<2x32xf32>
    %85 = math.exp %84 : vector<2x32xf32>
    %cst_30 = arith.constant 1.000000e+00 : f32
    %86 = vector.broadcast %cst_30 : f32 to vector<2x32xf32>
    %87 = arith.addf %86, %85 : vector<2x32xf32>
    %88 = arith.divf %86, %87 : vector<2x32xf32>
    %89 = arith.mulf %74, %47 : vector<2x32xf32>
    %90 = arith.mulf %65, %79 : vector<2x32xf32>
    %91 = arith.addf %89, %90 : vector<2x32xf32>
    %92 = math.tanh %91 : vector<2x32xf32>
    %93 = arith.mulf %88, %92 : vector<2x32xf32>
    %94 = arith.index_cast %c1_i32 : i32 to index
    %c0_31 = arith.constant 0 : index
    %c0_32 = arith.constant 0 : index
    %95 = vector.load %arg2[%94, %c0_31, %c0_32] : memref<8x2x32xf32, #tpu.memory_space<vmem>>, vector<1x2x32xf32>
    %96 = vector.shape_cast %95 : vector<1x2x32xf32> to vector<2x32xf32>
    %97 = vector.shape_cast %93 : vector<2x32xf32> to vector<1x2x32xf32>
    tpu.vector_store %arg2[%94, %c0_31, %c0_32], %97 {strides = array<i32>} : memref<8x2x32xf32, #tpu.memory_space<vmem>>, vector<1x2x32xf32>,
    %c2_i32 = arith.constant 2 : i32
    %98 = arith.index_cast %c2_i32 : i32 to index
    %c0_33 = arith.constant 0 : index
    %c0_34 = arith.constant 0 : index
    %c0_35 = arith.constant 0 : index
    %99 = vector.load %arg0[%98, %c0_33, %c0_34, %c0_35] : memref<8x4x2x32xf32, #tpu.memory_space<vmem>>, vector<1x4x2x32xf32>
    %100 = vector.shape_cast %99 : vector<1x4x2x32xf32> to vector<4x2x32xf32>
    %101 = vector.extract_strided_slice %100 {offsets = [0, 0, 0], sizes = [1, 2, 32], strides = [1, 1, 1]} : vector<4x2x32xf32> to vector<1x2x32xf32>
    %102 = vector.shape_cast %101 : vector<1x2x32xf32> to vector<2x32xf32>
    %cst_36 = arith.constant dense<0.000000e+00> : vector<2x32xf32>
    %103 = tpu.matmul %93, %1, %cst_36 {dimension_numbers = #tpu.dot_dimension_numbers<[1], [0], [0], [1], [0, 0, 1, 1], [], []>} : vector<2x32xf32>, vector<32x32xf32>, vector<2x32xf32> -> vector<2x32xf32>
    %104 = arith.addf %102, %103 : vector<2x32xf32>
    %105 = arith.negf %104 : vector<2x32xf32>
    %106 = math.exp %105 : vector<2x32xf32>
    %cst_37 = arith.constant 1.000000e+00 : f32
    %107 = vector.broadcast %cst_37 : f32 to vector<2x32xf32>
    %108 = arith.addf %107, %106 : vector<2x32xf32>
    %109 = arith.divf %107, %108 : vector<2x32xf32>
    %110 = vector.extract_strided_slice %100 {offsets = [1, 0, 0], sizes = [1, 2, 32], strides = [1, 1, 1]} : vector<4x2x32xf32> to vector<1x2x32xf32>
    %111 = vector.shape_cast %110 : vector<1x2x32xf32> to vector<2x32xf32>
    %cst_38 = arith.constant dense<0.000000e+00> : vector<2x32xf32>
    %112 = tpu.matmul %93, %3, %cst_38 {dimension_numbers = #tpu.dot_dimension_numbers<[1], [0], [0], [1], [0, 0, 1, 1], [], []>} : vector<2x32xf32>, vector<32x32xf32>, vector<2x32xf32> -> vector<2x32xf32>
    %113 = arith.addf %111, %112 : vector<2x32xf32>
    %114 = arith.negf %113 : vector<2x32xf32>
    %115 = math.exp %114 : vector<2x32xf32>
    %cst_39 = arith.constant 1.000000e+00 : f32
    %116 = vector.broadcast %cst_39 : f32 to vector<2x32xf32>
    %117 = arith.addf %116, %115 : vector<2x32xf32>
    %118 = arith.divf %116, %117 : vector<2x32xf32>
    %119 = vector.extract_strided_slice %100 {offsets = [2, 0, 0], sizes = [1, 2, 32], strides = [1, 1, 1]} : vector<4x2x32xf32> to vector<1x2x32xf32>
    %120 = vector.shape_cast %119 : vector<1x2x32xf32> to vector<2x32xf32>
    %cst_40 = arith.constant dense<0.000000e+00> : vector<2x32xf32>
    %121 = tpu.matmul %93, %5, %cst_40 {dimension_numbers = #tpu.dot_dimension_numbers<[1], [0], [0], [1], [0, 0, 1, 1], [], []>} : vector<2x32xf32>, vector<32x32xf32>, vector<2x32xf32> -> vector<2x32xf32>
    %122 = arith.addf %120, %121 : vector<2x32xf32>
    %123 = math.tanh %122 : vector<2x32xf32>
    %124 = vector.extract_strided_slice %100 {offsets = [3, 0, 0], sizes = [1, 2, 32], strides = [1, 1, 1]} : vector<4x2x32xf32> to vector<1x2x32xf32>
    %125 = vector.shape_cast %124 : vector<1x2x32xf32> to vector<2x32xf32>
    %cst_41 = arith.constant dense<0.000000e+00> : vector<2x32xf32>
    %126 = tpu.matmul %93, %7, %cst_41 {dimension_numbers = #tpu.dot_dimension_numbers<[1], [0], [0], [1], [0, 0, 1, 1], [], []>} : vector<2x32xf32>, vector<32x32xf32>, vector<2x32xf32> -> vector<2x32xf32>
    %127 = arith.addf %125, %126 : vector<2x32xf32>
    %128 = arith.negf %127 : vector<2x32xf32>
    %129 = math.exp %128 : vector<2x32xf32>
    %cst_42 = arith.constant 1.000000e+00 : f32
    %130 = vector.broadcast %cst_42 : f32 to vector<2x32xf32>
    %131 = arith.addf %130, %129 : vector<2x32xf32>
    %132 = arith.divf %130, %131 : vector<2x32xf32>
    %133 = arith.mulf %118, %91 : vector<2x32xf32>
    %134 = arith.mulf %109, %123 : vector<2x32xf32>
    %135 = arith.addf %133, %134 : vector<2x32xf32>
    %136 = math.tanh %135 : vector<2x32xf32>
    %137 = arith.mulf %132, %136 : vector<2x32xf32>
    %138 = arith.index_cast %c2_i32 : i32 to index
    %c0_43 = arith.constant 0 : index
    %c0_44 = arith.constant 0 : index
    %139 = vector.load %arg2[%138, %c0_43, %c0_44] : memref<8x2x32xf32, #tpu.memory_space<vmem>>, vector<1x2x32xf32>
    %140 = vector.shape_cast %139 : vector<1x2x32xf32> to vector<2x32xf32>
    %141 = vector.shape_cast %137 : vector<2x32xf32> to vector<1x2x32xf32>
    tpu.vector_store %arg2[%138, %c0_43, %c0_44], %141 {strides = array<i32>} : memref<8x2x32xf32, #tpu.memory_space<vmem>>, vector<1x2x32xf32>,
    %c3_i32 = arith.constant 3 : i32
    %142 = arith.index_cast %c3_i32 : i32 to index
    %c0_45 = arith.constant 0 : index
    %c0_46 = arith.constant 0 : index
    %c0_47 = arith.constant 0 : index
    %143 = vector.load %arg0[%142, %c0_45, %c0_46, %c0_47] : memref<8x4x2x32xf32, #tpu.memory_space<vmem>>, vector<1x4x2x32xf32>
    %144 = vector.shape_cast %143 : vector<1x4x2x32xf32> to vector<4x2x32xf32>
    %145 = vector.extract_strided_slice %144 {offsets = [0, 0, 0], sizes = [1, 2, 32], strides = [1, 1, 1]} : vector<4x2x32xf32> to vector<1x2x32xf32>
    %146 = vector.shape_cast %145 : vector<1x2x32xf32> to vector<2x32xf32>
    %cst_48 = arith.constant dense<0.000000e+00> : vector<2x32xf32>
    %147 = tpu.matmul %137, %1, %cst_48 {dimension_numbers = #tpu.dot_dimension_numbers<[1], [0], [0], [1], [0, 0, 1, 1], [], []>} : vector<2x32xf32>, vector<32x32xf32>, vector<2x32xf32> -> vector<2x32xf32>
    %148 = arith.addf %146, %147 : vector<2x32xf32>
    %149 = arith.negf %148 : vector<2x32xf32>
    %150 = math.exp %149 : vector<2x32xf32>
    %cst_49 = arith.constant 1.000000e+00 : f32
    %151 = vector.broadcast %cst_49 : f32 to vector<2x32xf32>
    %152 = arith.addf %151, %150 : vector<2x32xf32>
    %153 = arith.divf %151, %152 : vector<2x32xf32>
    %154 = vector.extract_strided_slice %144 {offsets = [1, 0, 0], sizes = [1, 2, 32], strides = [1, 1, 1]} : vector<4x2x32xf32> to vector<1x2x32xf32>
    %155 = vector.shape_cast %154 : vector<1x2x32xf32> to vector<2x32xf32>
    %cst_50 = arith.constant dense<0.000000e+00> : vector<2x32xf32>
    %156 = tpu.matmul %137, %3, %cst_50 {dimension_numbers = #tpu.dot_dimension_numbers<[1], [0], [0], [1], [0, 0, 1, 1], [], []>} : vector<2x32xf32>, vector<32x32xf32>, vector<2x32xf32> -> vector<2x32xf32>
    %157 = arith.addf %155, %156 : vector<2x32xf32>
    %158 = arith.negf %157 : vector<2x32xf32>
    %159 = math.exp %158 : vector<2x32xf32>
    %cst_51 = arith.constant 1.000000e+00 : f32
    %160 = vector.broadcast %cst_51 : f32 to vector<2x32xf32>
    %161 = arith.addf %160, %159 : vector<2x32xf32>
    %162 = arith.divf %160, %161 : vector<2x32xf32>
    %163 = vector.extract_strided_slice %144 {offsets = [2, 0, 0], sizes = [1, 2, 32], strides = [1, 1, 1]} : vector<4x2x32xf32> to vector<1x2x32xf32>
    %164 = vector.shape_cast %163 : vector<1x2x32xf32> to vector<2x32xf32>
    %cst_52 = arith.constant dense<0.000000e+00> : vector<2x32xf32>
    %165 = tpu.matmul %137, %5, %cst_52 {dimension_numbers = #tpu.dot_dimension_numbers<[1], [0], [0], [1], [0, 0, 1, 1], [], []>} : vector<2x32xf32>, vector<32x32xf32>, vector<2x32xf32> -> vector<2x32xf32>
    %166 = arith.addf %164, %165 : vector<2x32xf32>
    %167 = math.tanh %166 : vector<2x32xf32>
    %168 = vector.extract_strided_slice %144 {offsets = [3, 0, 0], sizes = [1, 2, 32], strides = [1, 1, 1]} : vector<4x2x32xf32> to vector<1x2x32xf32>
    %169 = vector.shape_cast %168 : vector<1x2x32xf32> to vector<2x32xf32>
    %cst_53 = arith.constant dense<0.000000e+00> : vector<2x32xf32>
    %170 = tpu.matmul %137, %7, %cst_53 {dimension_numbers = #tpu.dot_dimension_numbers<[1], [0], [0], [1], [0, 0, 1, 1], [], []>} : vector<2x32xf32>, vector<32x32xf32>, vector<2x32xf32> -> vector<2x32xf32>
    %171 = arith.addf %169, %170 : vector<2x32xf32>
    %172 = arith.negf %171 : vector<2x32xf32>
    %173 = math.exp %172 : vector<2x32xf32>
    %cst_54 = arith.constant 1.000000e+00 : f32
    %174 = vector.broadcast %cst_54 : f32 to vector<2x32xf32>
    %175 = arith.addf %174, %173 : vector<2x32xf32>
    %176 = arith.divf %174, %175 : vector<2x32xf32>
    %177 = arith.mulf %162, %135 : vector<2x32xf32>
    %178 = arith.mulf %153, %167 : vector<2x32xf32>
    %179 = arith.addf %177, %178 : vector<2x32xf32>
    %180 = math.tanh %179 : vector<2x32xf32>
    %181 = arith.mulf %176, %180 : vector<2x32xf32>
    %182 = arith.index_cast %c3_i32 : i32 to index
    %c0_55 = arith.constant 0 : index
    %c0_56 = arith.constant 0 : index
    %183 = vector.load %arg2[%182, %c0_55, %c0_56] : memref<8x2x32xf32, #tpu.memory_space<vmem>>, vector<1x2x32xf32>
    %184 = vector.shape_cast %183 : vector<1x2x32xf32> to vector<2x32xf32>
    %185 = vector.shape_cast %181 : vector<2x32xf32> to vector<1x2x32xf32>
    tpu.vector_store %arg2[%182, %c0_55, %c0_56], %185 {strides = array<i32>} : memref<8x2x32xf32, #tpu.memory_space<vmem>>, vector<1x2x32xf32>,
    %c4_i32 = arith.constant 4 : i32
    %186 = arith.index_cast %c4_i32 : i32 to index
    %c0_57 = arith.constant 0 : index
    %c0_58 = arith.constant 0 : index
    %c0_59 = arith.constant 0 : index
    %187 = vector.load %arg0[%186, %c0_57, %c0_58, %c0_59] : memref<8x4x2x32xf32, #tpu.memory_space<vmem>>, vector<1x4x2x32xf32>
    %188 = vector.shape_cast %187 : vector<1x4x2x32xf32> to vector<4x2x32xf32>
    %189 = vector.extract_strided_slice %188 {offsets = [0, 0, 0], sizes = [1, 2, 32], strides = [1, 1, 1]} : vector<4x2x32xf32> to vector<1x2x32xf32>
    %190 = vector.shape_cast %189 : vector<1x2x32xf32> to vector<2x32xf32>
    %cst_60 = arith.constant dense<0.000000e+00> : vector<2x32xf32>
    %191 = tpu.matmul %181, %1, %cst_60 {dimension_numbers = #tpu.dot_dimension_numbers<[1], [0], [0], [1], [0, 0, 1, 1], [], []>} : vector<2x32xf32>, vector<32x32xf32>, vector<2x32xf32> -> vector<2x32xf32>
    %192 = arith.addf %190, %191 : vector<2x32xf32>
    %193 = arith.negf %192 : vector<2x32xf32>
    %194 = math.exp %193 : vector<2x32xf32>
    %cst_61 = arith.constant 1.000000e+00 : f32
    %195 = vector.broadcast %cst_61 : f32 to vector<2x32xf32>
    %196 = arith.addf %195, %194 : vector<2x32xf32>
    %197 = arith.divf %195, %196 : vector<2x32xf32>
    %198 = vector.extract_strided_slice %188 {offsets = [1, 0, 0], sizes = [1, 2, 32], strides = [1, 1, 1]} : vector<4x2x32xf32> to vector<1x2x32xf32>
    %199 = vector.shape_cast %198 : vector<1x2x32xf32> to vector<2x32xf32>
    %cst_62 = arith.constant dense<0.000000e+00> : vector<2x32xf32>
    %200 = tpu.matmul %181, %3, %cst_62 {dimension_numbers = #tpu.dot_dimension_numbers<[1], [0], [0], [1], [0, 0, 1, 1], [], []>} : vector<2x32xf32>, vector<32x32xf32>, vector<2x32xf32> -> vector<2x32xf32>
    %201 = arith.addf %199, %200 : vector<2x32xf32>
    %202 = arith.negf %201 : vector<2x32xf32>
    %203 = math.exp %202 : vector<2x32xf32>
    %cst_63 = arith.constant 1.000000e+00 : f32
    %204 = vector.broadcast %cst_63 : f32 to vector<2x32xf32>
    %205 = arith.addf %204, %203 : vector<2x32xf32>
    %206 = arith.divf %204, %205 : vector<2x32xf32>
    %207 = vector.extract_strided_slice %188 {offsets = [2, 0, 0], sizes = [1, 2, 32], strides = [1, 1, 1]} : vector<4x2x32xf32> to vector<1x2x32xf32>
    %208 = vector.shape_cast %207 : vector<1x2x32xf32> to vector<2x32xf32>
    %cst_64 = arith.constant dense<0.000000e+00> : vector<2x32xf32>
    %209 = tpu.matmul %181, %5, %cst_64 {dimension_numbers = #tpu.dot_dimension_numbers<[1], [0], [0], [1], [0, 0, 1, 1], [], []>} : vector<2x32xf32>, vector<32x32xf32>, vector<2x32xf32> -> vector<2x32xf32>
    %210 = arith.addf %208, %209 : vector<2x32xf32>
    %211 = math.tanh %210 : vector<2x32xf32>
    %212 = vector.extract_strided_slice %188 {offsets = [3, 0, 0], sizes = [1, 2, 32], strides = [1, 1, 1]} : vector<4x2x32xf32> to vector<1x2x32xf32>
    %213 = vector.shape_cast %212 : vector<1x2x32xf32> to vector<2x32xf32>
    %cst_65 = arith.constant dense<0.000000e+00> : vector<2x32xf32>
    %214 = tpu.matmul %181, %7, %cst_65 {dimension_numbers = #tpu.dot_dimension_numbers<[1], [0], [0], [1], [0, 0, 1, 1], [], []>} : vector<2x32xf32>, vector<32x32xf32>, vector<2x32xf32> -> vector<2x32xf32>
    %215 = arith.addf %213, %214 : vector<2x32xf32>
    %216 = arith.negf %215 : vector<2x32xf32>
    %217 = math.exp %216 : vector<2x32xf32>
    %cst_66 = arith.constant 1.000000e+00 : f32
    %218 = vector.broadcast %cst_66 : f32 to vector<2x32xf32>
    %219 = arith.addf %218, %217 : vector<2x32xf32>
    %220 = arith.divf %218, %219 : vector<2x32xf32>
    %221 = arith.mulf %206, %179 : vector<2x32xf32>
    %222 = arith.mulf %197, %211 : vector<2x32xf32>
    %223 = arith.addf %221, %222 : vector<2x32xf32>
    %224 = math.tanh %223 : vector<2x32xf32>
    %225 = arith.mulf %220, %224 : vector<2x32xf32>
    %226 = arith.index_cast %c4_i32 : i32 to index
    %c0_67 = arith.constant 0 : index
    %c0_68 = arith.constant 0 : index
    %227 = vector.load %arg2[%226, %c0_67, %c0_68] : memref<8x2x32xf32, #tpu.memory_space<vmem>>, vector<1x2x32xf32>
    %228 = vector.shape_cast %227 : vector<1x2x32xf32> to vector<2x32xf32>
    %229 = vector.shape_cast %225 : vector<2x32xf32> to vector<1x2x32xf32>
    tpu.vector_store %arg2[%226, %c0_67, %c0_68], %229 {strides = array<i32>} : memref<8x2x32xf32, #tpu.memory_space<vmem>>, vector<1x2x32xf32>,
    %c5_i32 = arith.constant 5 : i32
    %230 = arith.index_cast %c5_i32 : i32 to index
    %c0_69 = arith.constant 0 : index
    %c0_70 = arith.constant 0 : index
    %c0_71 = arith.constant 0 : index
    %231 = vector.load %arg0[%230, %c0_69, %c0_70, %c0_71] : memref<8x4x2x32xf32, #tpu.memory_space<vmem>>, vector<1x4x2x32xf32>
    %232 = vector.shape_cast %231 : vector<1x4x2x32xf32> to vector<4x2x32xf32>
    %233 = vector.extract_strided_slice %232 {offsets = [0, 0, 0], sizes = [1, 2, 32], strides = [1, 1, 1]} : vector<4x2x32xf32> to vector<1x2x32xf32>
    %234 = vector.shape_cast %233 : vector<1x2x32xf32> to vector<2x32xf32>
    %cst_72 = arith.constant dense<0.000000e+00> : vector<2x32xf32>
    %235 = tpu.matmul %225, %1, %cst_72 {dimension_numbers = #tpu.dot_dimension_numbers<[1], [0], [0], [1], [0, 0, 1, 1], [], []>} : vector<2x32xf32>, vector<32x32xf32>, vector<2x32xf32> -> vector<2x32xf32>
    %236 = arith.addf %234, %235 : vector<2x32xf32>
    %237 = arith.negf %236 : vector<2x32xf32>
    %238 = math.exp %237 : vector<2x32xf32>
    %cst_73 = arith.constant 1.000000e+00 : f32
    %239 = vector.broadcast %cst_73 : f32 to vector<2x32xf32>
    %240 = arith.addf %239, %238 : vector<2x32xf32>
    %241 = arith.divf %239, %240 : vector<2x32xf32>
    %242 = vector.extract_strided_slice %232 {offsets = [1, 0, 0], sizes = [1, 2, 32], strides = [1, 1, 1]} : vector<4x2x32xf32> to vector<1x2x32xf32>
    %243 = vector.shape_cast %242 : vector<1x2x32xf32> to vector<2x32xf32>
    %cst_74 = arith.constant dense<0.000000e+00> : vector<2x32xf32>
    %244 = tpu.matmul %225, %3, %cst_74 {dimension_numbers = #tpu.dot_dimension_numbers<[1], [0], [0], [1], [0, 0, 1, 1], [], []>} : vector<2x32xf32>, vector<32x32xf32>, vector<2x32xf32> -> vector<2x32xf32>
    %245 = arith.addf %243, %244 : vector<2x32xf32>
    %246 = arith.negf %245 : vector<2x32xf32>
    %247 = math.exp %246 : vector<2x32xf32>
    %cst_75 = arith.constant 1.000000e+00 : f32
    %248 = vector.broadcast %cst_75 : f32 to vector<2x32xf32>
    %249 = arith.addf %248, %247 : vector<2x32xf32>
    %250 = arith.divf %248, %249 : vector<2x32xf32>
    %251 = vector.extract_strided_slice %232 {offsets = [2, 0, 0], sizes = [1, 2, 32], strides = [1, 1, 1]} : vector<4x2x32xf32> to vector<1x2x32xf32>
    %252 = vector.shape_cast %251 : vector<1x2x32xf32> to vector<2x32xf32>
    %cst_76 = arith.constant dense<0.000000e+00> : vector<2x32xf32>
    %253 = tpu.matmul %225, %5, %cst_76 {dimension_numbers = #tpu.dot_dimension_numbers<[1], [0], [0], [1], [0, 0, 1, 1], [], []>} : vector<2x32xf32>, vector<32x32xf32>, vector<2x32xf32> -> vector<2x32xf32>
    %254 = arith.addf %252, %253 : vector<2x32xf32>
    %255 = math.tanh %254 : vector<2x32xf32>
    %256 = vector.extract_strided_slice %232 {offsets = [3, 0, 0], sizes = [1, 2, 32], strides = [1, 1, 1]} : vector<4x2x32xf32> to vector<1x2x32xf32>
    %257 = vector.shape_cast %256 : vector<1x2x32xf32> to vector<2x32xf32>
    %cst_77 = arith.constant dense<0.000000e+00> : vector<2x32xf32>
    %258 = tpu.matmul %225, %7, %cst_77 {dimension_numbers = #tpu.dot_dimension_numbers<[1], [0], [0], [1], [0, 0, 1, 1], [], []>} : vector<2x32xf32>, vector<32x32xf32>, vector<2x32xf32> -> vector<2x32xf32>
    %259 = arith.addf %257, %258 : vector<2x32xf32>
    %260 = arith.negf %259 : vector<2x32xf32>
    %261 = math.exp %260 : vector<2x32xf32>
    %cst_78 = arith.constant 1.000000e+00 : f32
    %262 = vector.broadcast %cst_78 : f32 to vector<2x32xf32>
    %263 = arith.addf %262, %261 : vector<2x32xf32>
    %264 = arith.divf %262, %263 : vector<2x32xf32>
    %265 = arith.mulf %250, %223 : vector<2x32xf32>
    %266 = arith.mulf %241, %255 : vector<2x32xf32>
    %267 = arith.addf %265, %266 : vector<2x32xf32>
    %268 = math.tanh %267 : vector<2x32xf32>
    %269 = arith.mulf %264, %268 : vector<2x32xf32>
    %270 = arith.index_cast %c5_i32 : i32 to index
    %c0_79 = arith.constant 0 : index
    %c0_80 = arith.constant 0 : index
    %271 = vector.load %arg2[%270, %c0_79, %c0_80] : memref<8x2x32xf32, #tpu.memory_space<vmem>>, vector<1x2x32xf32>
    %272 = vector.shape_cast %271 : vector<1x2x32xf32> to vector<2x32xf32>
    %273 = vector.shape_cast %269 : vector<2x32xf32> to vector<1x2x32xf32>
    tpu.vector_store %arg2[%270, %c0_79, %c0_80], %273 {strides = array<i32>} : memref<8x2x32xf32, #tpu.memory_space<vmem>>, vector<1x2x32xf32>,
    %c6_i32 = arith.constant 6 : i32
    %274 = arith.index_cast %c6_i32 : i32 to index
    %c0_81 = arith.constant 0 : index
    %c0_82 = arith.constant 0 : index
    %c0_83 = arith.constant 0 : index
    %275 = vector.load %arg0[%274, %c0_81, %c0_82, %c0_83] : memref<8x4x2x32xf32, #tpu.memory_space<vmem>>, vector<1x4x2x32xf32>
    %276 = vector.shape_cast %275 : vector<1x4x2x32xf32> to vector<4x2x32xf32>
    %277 = vector.extract_strided_slice %276 {offsets = [0, 0, 0], sizes = [1, 2, 32], strides = [1, 1, 1]} : vector<4x2x32xf32> to vector<1x2x32xf32>
    %278 = vector.shape_cast %277 : vector<1x2x32xf32> to vector<2x32xf32>
    %cst_84 = arith.constant dense<0.000000e+00> : vector<2x32xf32>
    %279 = tpu.matmul %269, %1, %cst_84 {dimension_numbers = #tpu.dot_dimension_numbers<[1], [0], [0], [1], [0, 0, 1, 1], [], []>} : vector<2x32xf32>, vector<32x32xf32>, vector<2x32xf32> -> vector<2x32xf32>
    %280 = arith.addf %278, %279 : vector<2x32xf32>
    %281 = arith.negf %280 : vector<2x32xf32>
    %282 = math.exp %281 : vector<2x32xf32>
    %cst_85 = arith.constant 1.000000e+00 : f32
    %283 = vector.broadcast %cst_85 : f32 to vector<2x32xf32>
    %284 = arith.addf %283, %282 : vector<2x32xf32>
    %285 = arith.divf %283, %284 : vector<2x32xf32>
    %286 = vector.extract_strided_slice %276 {offsets = [1, 0, 0], sizes = [1, 2, 32], strides = [1, 1, 1]} : vector<4x2x32xf32> to vector<1x2x32xf32>
    %287 = vector.shape_cast %286 : vector<1x2x32xf32> to vector<2x32xf32>
    %cst_86 = arith.constant dense<0.000000e+00> : vector<2x32xf32>
    %288 = tpu.matmul %269, %3, %cst_86 {dimension_numbers = #tpu.dot_dimension_numbers<[1], [0], [0], [1], [0, 0, 1, 1], [], []>} : vector<2x32xf32>, vector<32x32xf32>, vector<2x32xf32> -> vector<2x32xf32>
    %289 = arith.addf %287, %288 : vector<2x32xf32>
    %290 = arith.negf %289 : vector<2x32xf32>
    %291 = math.exp %290 : vector<2x32xf32>
    %cst_87 = arith.constant 1.000000e+00 : f32
    %292 = vector.broadcast %cst_87 : f32 to vector<2x32xf32>
    %293 = arith.addf %292, %291 : vector<2x32xf32>
    %294 = arith.divf %292, %293 : vector<2x32xf32>
    %295 = vector.extract_strided_slice %276 {offsets = [2, 0, 0], sizes = [1, 2, 32], strides = [1, 1, 1]} : vector<4x2x32xf32> to vector<1x2x32xf32>
    %296 = vector.shape_cast %295 : vector<1x2x32xf32> to vector<2x32xf32>
    %cst_88 = arith.constant dense<0.000000e+00> : vector<2x32xf32>
    %297 = tpu.matmul %269, %5, %cst_88 {dimension_numbers = #tpu.dot_dimension_numbers<[1], [0], [0], [1], [0, 0, 1, 1], [], []>} : vector<2x32xf32>, vector<32x32xf32>, vector<2x32xf32> -> vector<2x32xf32>
    %298 = arith.addf %296, %297 : vector<2x32xf32>
    %299 = math.tanh %298 : vector<2x32xf32>
    %300 = vector.extract_strided_slice %276 {offsets = [3, 0, 0], sizes = [1, 2, 32], strides = [1, 1, 1]} : vector<4x2x32xf32> to vector<1x2x32xf32>
    %301 = vector.shape_cast %300 : vector<1x2x32xf32> to vector<2x32xf32>
    %cst_89 = arith.constant dense<0.000000e+00> : vector<2x32xf32>
    %302 = tpu.matmul %269, %7, %cst_89 {dimension_numbers = #tpu.dot_dimension_numbers<[1], [0], [0], [1], [0, 0, 1, 1], [], []>} : vector<2x32xf32>, vector<32x32xf32>, vector<2x32xf32> -> vector<2x32xf32>
    %303 = arith.addf %301, %302 : vector<2x32xf32>
    %304 = arith.negf %303 : vector<2x32xf32>
    %305 = math.exp %304 : vector<2x32xf32>
    %cst_90 = arith.constant 1.000000e+00 : f32
    %306 = vector.broadcast %cst_90 : f32 to vector<2x32xf32>
    %307 = arith.addf %306, %305 : vector<2x32xf32>
    %308 = arith.divf %306, %307 : vector<2x32xf32>
    %309 = arith.mulf %294, %267 : vector<2x32xf32>
    %310 = arith.mulf %285, %299 : vector<2x32xf32>
    %311 = arith.addf %309, %310 : vector<2x32xf32>
    %312 = math.tanh %311 : vector<2x32xf32>
    %313 = arith.mulf %308, %312 : vector<2x32xf32>
    %314 = arith.index_cast %c6_i32 : i32 to index
    %c0_91 = arith.constant 0 : index
    %c0_92 = arith.constant 0 : index
    %315 = vector.load %arg2[%314, %c0_91, %c0_92] : memref<8x2x32xf32, #tpu.memory_space<vmem>>, vector<1x2x32xf32>
    %316 = vector.shape_cast %315 : vector<1x2x32xf32> to vector<2x32xf32>
    %317 = vector.shape_cast %313 : vector<2x32xf32> to vector<1x2x32xf32>
    tpu.vector_store %arg2[%314, %c0_91, %c0_92], %317 {strides = array<i32>} : memref<8x2x32xf32, #tpu.memory_space<vmem>>, vector<1x2x32xf32>,
    %c7_i32 = arith.constant 7 : i32
    %318 = arith.index_cast %c7_i32 : i32 to index
    %c0_93 = arith.constant 0 : index
    %c0_94 = arith.constant 0 : index
    %c0_95 = arith.constant 0 : index
    %319 = vector.load %arg0[%318, %c0_93, %c0_94, %c0_95] : memref<8x4x2x32xf32, #tpu.memory_space<vmem>>, vector<1x4x2x32xf32>
    %320 = vector.shape_cast %319 : vector<1x4x2x32xf32> to vector<4x2x32xf32>
    %321 = vector.extract_strided_slice %320 {offsets = [0, 0, 0], sizes = [1, 2, 32], strides = [1, 1, 1]} : vector<4x2x32xf32> to vector<1x2x32xf32>
    %322 = vector.shape_cast %321 : vector<1x2x32xf32> to vector<2x32xf32>
    %cst_96 = arith.constant dense<0.000000e+00> : vector<2x32xf32>
    %323 = tpu.matmul %313, %1, %cst_96 {dimension_numbers = #tpu.dot_dimension_numbers<[1], [0], [0], [1], [0, 0, 1, 1], [], []>} : vector<2x32xf32>, vector<32x32xf32>, vector<2x32xf32> -> vector<2x32xf32>
    %324 = arith.addf %322, %323 : vector<2x32xf32>
    %325 = arith.negf %324 : vector<2x32xf32>
    %326 = math.exp %325 : vector<2x32xf32>
    %cst_97 = arith.constant 1.000000e+00 : f32
    %327 = vector.broadcast %cst_97 : f32 to vector<2x32xf32>
    %328 = arith.addf %327, %326 : vector<2x32xf32>
    %329 = arith.divf %327, %328 : vector<2x32xf32>
    %330 = vector.extract_strided_slice %320 {offsets = [1, 0, 0], sizes = [1, 2, 32], strides = [1, 1, 1]} : vector<4x2x32xf32> to vector<1x2x32xf32>
    %331 = vector.shape_cast %330 : vector<1x2x32xf32> to vector<2x32xf32>
    %cst_98 = arith.constant dense<0.000000e+00> : vector<2x32xf32>
    %332 = tpu.matmul %313, %3, %cst_98 {dimension_numbers = #tpu.dot_dimension_numbers<[1], [0], [0], [1], [0, 0, 1, 1], [], []>} : vector<2x32xf32>, vector<32x32xf32>, vector<2x32xf32> -> vector<2x32xf32>
    %333 = arith.addf %331, %332 : vector<2x32xf32>
    %334 = arith.negf %333 : vector<2x32xf32>
    %335 = math.exp %334 : vector<2x32xf32>
    %cst_99 = arith.constant 1.000000e+00 : f32
    %336 = vector.broadcast %cst_99 : f32 to vector<2x32xf32>
    %337 = arith.addf %336, %335 : vector<2x32xf32>
    %338 = arith.divf %336, %337 : vector<2x32xf32>
    %339 = vector.extract_strided_slice %320 {offsets = [2, 0, 0], sizes = [1, 2, 32], strides = [1, 1, 1]} : vector<4x2x32xf32> to vector<1x2x32xf32>
    %340 = vector.shape_cast %339 : vector<1x2x32xf32> to vector<2x32xf32>
    %cst_100 = arith.constant dense<0.000000e+00> : vector<2x32xf32>
    %341 = tpu.matmul %313, %5, %cst_100 {dimension_numbers = #tpu.dot_dimension_numbers<[1], [0], [0], [1], [0, 0, 1, 1], [], []>} : vector<2x32xf32>, vector<32x32xf32>, vector<2x32xf32> -> vector<2x32xf32>
    %342 = arith.addf %340, %341 : vector<2x32xf32>
    %343 = math.tanh %342 : vector<2x32xf32>
    %344 = vector.extract_strided_slice %320 {offsets = [3, 0, 0], sizes = [1, 2, 32], strides = [1, 1, 1]} : vector<4x2x32xf32> to vector<1x2x32xf32>
    %345 = vector.shape_cast %344 : vector<1x2x32xf32> to vector<2x32xf32>
    %cst_101 = arith.constant dense<0.000000e+00> : vector<2x32xf32>
    %346 = tpu.matmul %313, %7, %cst_101 {dimension_numbers = #tpu.dot_dimension_numbers<[1], [0], [0], [1], [0, 0, 1, 1], [], []>} : vector<2x32xf32>, vector<32x32xf32>, vector<2x32xf32> -> vector<2x32xf32>
    %347 = arith.addf %345, %346 : vector<2x32xf32>
    %348 = arith.negf %347 : vector<2x32xf32>
    %349 = math.exp %348 : vector<2x32xf32>
    %cst_102 = arith.constant 1.000000e+00 : f32
    %350 = vector.broadcast %cst_102 : f32 to vector<2x32xf32>
    %351 = arith.addf %350, %349 : vector<2x32xf32>
    %352 = arith.divf %350, %351 : vector<2x32xf32>
    %353 = arith.mulf %338, %311 : vector<2x32xf32>
    %354 = arith.mulf %329, %343 : vector<2x32xf32>
    %355 = arith.addf %353, %354 : vector<2x32xf32>
    %356 = math.tanh %355 : vector<2x32xf32>
    %357 = arith.mulf %352, %356 : vector<2x32xf32>
    %358 = arith.index_cast %c7_i32 : i32 to index
    %c0_103 = arith.constant 0 : index
    %c0_104 = arith.constant 0 : index
    %359 = vector.load %arg2[%358, %c0_103, %c0_104] : memref<8x2x32xf32, #tpu.memory_space<vmem>>, vector<1x2x32xf32>
    %360 = vector.shape_cast %359 : vector<1x2x32xf32> to vector<2x32xf32>
    %361 = vector.shape_cast %357 : vector<2x32xf32> to vector<1x2x32xf32>
    tpu.vector_store %arg2[%358, %c0_103, %c0_104], %361 {strides = array<i32>} : memref<8x2x32xf32, #tpu.memory_space<vmem>>, vector<1x2x32xf32>,
    %c8_i32 = arith.constant 8 : i32
    %c0_105 = arith.constant 0 : index
    %c0_106 = arith.constant 0 : index
    %362 = vector.load %arg3[%c0_105, %c0_106] : memref<2x32xf32, #tpu.memory_space<vmem>>, vector<2x32xf32>
    tpu.vector_store %arg3[%c0_105, %c0_106], %357 {strides = array<i32>} : memref<2x32xf32, #tpu.memory_space<vmem>>, vector<2x32xf32>,
    %c0_107 = arith.constant 0 : index
    %c0_108 = arith.constant 0 : index
    %363 = vector.load %arg4[%c0_107, %c0_108] : memref<2x32xf32, #tpu.memory_space<vmem>>, vector<2x32xf32>
    tpu.vector_store %arg4[%c0_107, %c0_108], %355 {strides = array<i32>} : memref<2x32xf32, #tpu.memory_space<vmem>>, vector<2x32xf32>,
    return
  }
}

</mosaic_0001>

<bundles_post_ra>
// kernel: tpu_custom_call.1
= control target key start
LH: loop header
LB: loop body
LE: loop exit
PB: predicated region body
PF: predicated region fallthrough
CT: control target
= control target key end

     0   :  { %10 = vsyncpa [#allocation3], 0  ;;  %s4059_s0 = inlined_call_operand.hbm [shape: f32[8,4,2,32], index: 0, kind: input, shape index: {}]   ;;  %s4060_s1 = inlined_call_operand.hbm [shape: f32[4,32,32], index: 1, kind: input, shape index: {}]   ;;  %s4061_s2 = inlined_call_operand.hbm [shape: f32[8,2,32], index: 2, kind: output, shape index: {0}]   ;;  %s4062_s3 = inlined_call_operand.hbm [shape: f32[2,32], index: 3, kind: output, shape index: {1}]   ;;  %s4063_s4 = inlined_call_operand.hbm [shape: f32[2,32], index: 4, kind: output, shape index: {2}]  }
   0x1   :  { %11 = vsyncpa [#allocation6], 0 }
   0x2   :  { %12 = vsyncpa [#allocation4], 0 }
   0x3   :  { %13 = vsyncpa [#allocation9], 0  ;;  %s3668_s15 = smov [#allocation2]   ;;  %s3550_s19 = scalar_lea.hbm %s4059_s0, 1024 }
   0x4   :  { %s19_s16 = sshll.u32 %s3668_s15, 4  ;;  %p3551_p0 = scmp.ne.s32.totalorder %s4059_s0, %s3550_s19  ;;  %s20_s16 = int_to_ptr.vmem [resolvable:$true] %s19_s16 }
   0x5   :  { %p3554_p1 = scmp.lt.u32.totalorder %s3550_s19, %s4059_s0 }
   0x7   :  { %p3556_p2 = pnand %p3554_p1, %p3551_p0 }
   0x9   :  { %3559 = shalt.err (!%p3556_p2)
}
   0xa   :  { %s3560_s24 = scalar_lea.vmem %s20_s16, 1024  ;;  %p3565_p4 = scmp.lt.s32.totalorder %s20_s16, %s20_s16 }
   0xb   :  { %p3561_p3 = scmp.ne.s32.totalorder %s20_s16, %s3560_s24  ;;  %p3566_p5 = scmp.lt.s32.totalorder %s3560_s24, %s3560_s24 }
   0xd   :  { %p3567_p6 = por %p3566_p5, %p3565_p4 }
   0xf   :  { %p3568_p7 = pnand %p3567_p6, %p3561_p3 }
  0x11   :  { %3571 = shalt.err (!%p3568_p7)
}
  0x12   :  { %s3669_s25 = smov 32   ;;  %s3670_s26 = smov 2  }
  0x13   :  { %25 = dma.hbm_to_vmem [thread:$0]  %s4059_s0, 1024, %s20_s16, [#allocation3], %s3669_s25, %s3669_s25, %s3670_s26  }
  0x14   :  { %s3671_s29 = smov [#allocation5]   ;;  %s3572_s7 = scalar_lea.hbm %s4060_s1, 2048 }
  0x15   :  { %s31_s30 = sshll.u32 %s3671_s29, 4  ;;  %p3573_p8 = scmp.ne.s32.totalorder %s4060_s1, %s3572_s7  ;;  %s32_s30 = int_to_ptr.vmem [resolvable:$true] %s31_s30 }
  0x16   :  { %p3576_p9 = scmp.lt.u32.totalorder %s3572_s7, %s4060_s1 }
  0x18   :  { %p3578_p10 = pnand %p3576_p9, %p3573_p8 }
  0x1a   :  { %3581 = shalt.err (!%p3578_p10)
}
  0x1b   :  { %s3582_s12 = scalar_lea.vmem %s32_s30, 2048  ;;  %p3587_p12 = scmp.lt.s32.totalorder %s32_s30, %s32_s30 }
  0x1c   :  { %p3583_p11 = scmp.ne.s32.totalorder %s32_s30, %s3582_s12  ;;  %p3588_p13 = scmp.lt.s32.totalorder %s3582_s12, %s3582_s12 }
  0x1e   :  { %p3589_p0 = por %p3588_p13, %p3587_p12 }
  0x20   :  { %p3590_p1 = pnand %p3589_p0, %p3583_p11 }
  0x22   :  { %3593 = shalt.err (!%p3590_p1)
}
  0x23   :  { %s3672_s0 = smov 128   ;;  %s3673_s13 = smov 8  }
  0x24   :  { %37 = dma.hbm_to_vmem [thread:$0]  %s4060_s1, 2048, %s32_s30, [#allocation6], %s3672_s0, %s3672_s0, %s3673_s13  }
  0x25   :  { %3660 = dma.done.wait [#allocation3], 1024  }
  0x26   :  { %3661 = vsyncadd [#allocation3], 4294966272 }
  0x27   :  { %3662 = dma.done.wait [#allocation6], 2048  }
  0x28   :  { %3663 = vsyncadd [#allocation6], 4294965248  ;;  %v3674_v0 = vmov 0.0|0.0   ;;  %vm3675_vm0 = vmmov 0   ;;  %v3676_v1 = vmov 0.0   ;;  %v44_v2 = vld [vmem:[#allocation5] sm:$0xff] }
  0x29   :  { %3218 = vmatprep.subr.bf16.mxu0 %v3674_v0  ;;  %3224 = vmatprep.subr.bf16.mxu1 %v3674_v0  ;;  %v45_v3 = vld [vmem:[#allocation5 + $0x8] sm:$0xff]  ;;  %v49_v4 = vld [vmem:[#allocation5 + $0x20] sm:$0xff]  ;;  %v46_v7 = vld [vmem:[#allocation5 + $0x10] sm:$0xff]  ;;  %vm67_vm1 = vcmask 261120   ;;  %vm379_vm2 = vcmask 254976   ;;  %s3677_s1 = smov [#allocation8]  }
  0x2a   :  { %2874 = vmatprep.mubr.msk.f32.mxu0 %vm3675_vm0, %v3676_v1  ;;  %2885 = vmatprep.mubr.msk.f32.mxu1 %vm3675_vm0, %v3676_v1  ;;  %v3738_v5 = vpack.c.bf16 %v45_v3, %v44_v2  ;;  %v50_v6 = vld [vmem:[#allocation5 + $0x28] sm:$0xff]  ;;  %v47_v8 = vld [vmem:[#allocation5 + $0x18] sm:$0xff]  ;;  %v51_v10 = vld [vmem:[#allocation5 + $0x30] sm:$0xff]  ;;  %s2627_s16 = sshll.u32 %s3677_s1, 4  ;;  %s3678_s17 = smov [#allocation7]   ;;  %s2628_s16 = int_to_ptr.vmem [resolvable:$true] %s2627_s16 }
  0x2b   :  { %v3740_v9 = vpack.c.bf16 %v50_v6, %v49_v4  ;;  %v52_v11 = vld [vmem:[#allocation5 + $0x38] sm:$0xff]  ;;  %v3743_v12 = vpack.c.bf16 %v47_v8, %v46_v7  ;;  %v54_v14 = vld [vmem:[#allocation5 + $0x40] sm:$0xff]  ;;  %v55_v15 = vld [vmem:[#allocation5 + $0x48] sm:$0xff]  ;;  %s2614_s18 = sshll.u32 %s3678_s17, 4  ;;  %s3679_s19 = smov [#allocation10]   ;;  %s4004_s18 = int_to_ptr.vmem [resolvable:$true] %s2614_s18 }
  0x2c   :  { %3220 = vmatpush3.bf16.msra.mxu0 %v3738_v5  ;;  %v3747_v13 = vpack.c.bf16 %v52_v11, %v51_v10  ;;  %v59_v16 = vld [vmem:[#allocation5 + $0x60] sm:$0xff]  ;;  %v60_v17 = vld [vmem:[#allocation5 + $0x68] sm:$0xff]  ;;  %v3751_v18 = vpack.c.bf16 %v55_v15, %v54_v14  ;;  %v56_v20 = vld [vmem:[#allocation5 + $0x50] sm:$0xff]  ;;  %s2637_s20 = sshll.u32 %s3679_s19, 4  ;;  %s3594_s21 = scalar_lea.vmem %s2628_s16, 32  ;;  %s4008_s20 = int_to_ptr.vmem [resolvable:$true] %s2637_s20 }
  0x2d   :  { %3226 = vmatpush3.bf16.msra.mxu1 %v3740_v9  ;;  %3221 = vmatprep.subr.bf16.mxu0 %v3674_v0  ;;  %v3755_v19 = vpack.c.bf16 %v60_v17, %v59_v16  ;;  %v57_v21 = vld [vmem:[#allocation5 + $0x58] sm:$0xff]  ;;  %v61_v22 = vld [vmem:[#allocation5 + $0x70] sm:$0xff]  ;;  %v63_v26 = vld [vmem:[#allocation2] sm:$0x3]  ;;  %p3595_p2 = scmp.ne.s32.totalorder %s2628_s16, %s3594_s21  ;;  %p3599_p3 = scmp.lt.s32.totalorder %s2628_s16, %s2628_s16 }
  0x2e   :  { %3227 = vmatprep.subr.bf16.mxu1 %v3674_v0  ;;  %v62_v23 = vld [vmem:[#allocation5 + $0x78] sm:$0xff]  ;;  %v3761_v24 = vpack.c.bf16 %v57_v21, %v56_v20  ;;  %v64_v27 = vld [vmem:[#allocation2 + $0x2] sm:$0x3]  ;;  %v66_v36 = vld [vmem:[#allocation2 + $0x6] sm:$0x3]  ;;  %p3600_p4 = scmp.lt.s32.totalorder %s3594_s21, %s3594_s21 }
  0x2f   :  { %v3765_v25 = vpack.c.bf16 %v62_v23, %v61_v22  ;;  %v65_v38 = vld [vmem:[#allocation2 + $0x4] sm:$0x3]  ;;  %v382_v60 = vld [vmem:[#allocation2 + $0x8] sm:$0x3]  ;;  %v383_v61 = vld [vmem:[#allocation2 + $0xa] sm:$0x3] }
  0x30   :  { %3223 = vmatpush3.bf16.msra.mxu0 %v3743_v12  ;;  %v385_v10 = vld [vmem:[#allocation2 + $0xe] sm:$0x3]  ;;  %v384_v20 = vld [vmem:[#allocation2 + $0xc] sm:$0x3]  ;;  %p3601_p5 = por %p3600_p4, %p3599_p3 }
  0x31   :  { %3229 = vmatpush3.bf16.msra.mxu1 %v3747_v13  ;;  %3230 = vmatprep.subr.bf16.mxu0 %v3674_v0 }
  0x32   :  { %3236 = vmatprep.subr.bf16.mxu1 %v3674_v0  ;;  %p3602_p6 = pnand %p3601_p5, %p3595_p2 }
  0x33   :  { %2875 = vmatmul.mubr.f32.vlgmr.msra.gmra.mrb[0].mxu0 %v3676_v1 }
  0x34   :  { %2886 = vmatmul.mubr.f32.vlgmr.msra.gmra.mrb[0].mxu1 %v3676_v1  ;;  %3232 = vmatpush3.bf16.msra.mxu0 %v3751_v18 }
  0x35   :  { %3238 = vmatpush3.bf16.msra.mxu1 %v3755_v19  ;;  %3233 = vmatprep.subr.bf16.mxu0 %v3674_v0 }
  0x36   :  { %3239 = vmatprep.subr.bf16.mxu1 %v3674_v0  ;;  %2896 = vmatprep.mubr.msk.f32.mxu0 %vm3675_vm0, %v3676_v1 }
  0x37   :  { %2907 = vmatprep.mubr.msk.f32.mxu1 %vm3675_vm0, %v3676_v1 }
  0x38   :  { %3235 = vmatpush3.bf16.msra.mxu0 %v3761_v24 }
  0x39   :  { %3241 = vmatpush3.bf16.msra.mxu1 %v3765_v25  ;;  %3242 = vmatprep.subr.bf16.mxu0 %v3674_v0 }
  0x3a   :  { %3248 = vmatprep.subr.bf16.mxu1 %v3674_v0 }
  0x3b   :  { %2897 = vmatmul.mubr.f32.vlgmr.msra.gmra.mrb[2].mxu0 %v3676_v1 }
  0x3c   :  { %2908 = vmatmul.mubr.f32.vlgmr.msra.gmra.mrb[2].mxu1 %v3676_v1  ;;  %3244 = vmatpush3.bf16.msra.mxu0 %v3738_v5 }
  0x3d   :  { %3250 = vmatpush3.bf16.msra.mxu1 %v3740_v9  ;;  %3245 = vmatprep.subr.bf16.mxu0 %v3674_v0 }
  0x3e   :  { %3251 = vmatprep.subr.bf16.mxu1 %v3674_v0  ;;  %2918 = vmatprep.mubr.msk.f32.mxu0 %vm3675_vm0, %v3676_v1 }
  0x3f   :  { %2929 = vmatprep.mubr.msk.f32.mxu1 %vm3675_vm0, %v3676_v1 }
  0x40   :  { %3247 = vmatpush3.bf16.msra.mxu0 %v3743_v12 }
  0x41   :  { %3253 = vmatpush3.bf16.msra.mxu1 %v3747_v13  ;;  %3254 = vmatprep.subr.bf16.mxu0 %v3674_v0 }
  0x42   :  { %3260 = vmatprep.subr.bf16.mxu1 %v3674_v0 }
 0x106   :  { %v137_v28 = vpop.f32.mrb[0].mxu0 }
 0x107   :  { %v141_v29 = vadd.f32 %v137_v28, %v63_v26  ;;  %v214_v30 = vpop.f32.mrb[0].mxu1  ;;  %v2876_v31 = vpop.f32.mrb[1].mxu0 }
 0x108   :  { %v218_v32 = vadd.f32 %v214_v30, %v64_v27  ;;  %v2887_v33 = vpop.f32.mrb[1].mxu1 }
 0x109   :  { %v2654_v34 = vmul.f32 -1.442695, %v141_v29 }
 0x10a   :  { %v2655_v35 = vmul.f32 -1.442695, %v218_v32 }
 0x10b   :  { %3422 = vpow2.f32 %v2654_v34 }
 0x10c   :  { %3424 = vpow2.f32 %v2655_v35 }
 0x10e   :  { %v291_v37 = vpop.f32.mrb[2].mxu0 }
 0x10f   :  { %v363_v39 = vpop.f32.mrb[2].mxu1  ;;  %v2898_v40 = vpop.f32.mrb[3].mxu0  ;;  %v295_v43 = vadd.f32 %v291_v37, %v65_v38 }
 0x110   :  { %v367_v41 = vadd.f32 %v363_v39, %v66_v36  ;;  %v2909_v42 = vpop.f32.mrb[3].mxu1  ;;  %v700_v40 = vld [vmem:[#allocation2 + $0x10] sm:$0x3] }
 0x112   :  { %v2656_v44 = vmul.f32 -1.442695, %v367_v41  ;;  %v701_v41 = vld [vmem:[#allocation2 + $0x12] sm:$0x3] }
 0x114   :  { %3426 = vpow2.f32 %v2656_v44 }
 0x115   :  { %v3423_v45 = vpop.eup %3422  ;;  %3428 = vtanh.f32 %v295_v43 }
 0x116   :  { %v3425_v46 = vpop.eup %3424  ;;  %v145_v47 = vadd.f32 1.0, %v3423_v45 }
 0x117   :  { %v222_v48 = vadd.f32 1.0, %v3425_v46 }
 0x118   :  { %3430 = vrcp.f32 %v145_v47 }
 0x119   :  { %3432 = vrcp.f32 %v222_v48 }
 0x11e   :  { %v3427_v49 = vpop.eup %3426 }
 0x11f   :  { %v3429_v50 = vpop.eup %3428  ;;  %v371_v52 = vadd.f32 1.0, %v3427_v49 }
 0x121   :  { %3434 = vrcp.f32 %v371_v52 }
 0x122   :  { %v3431_v51 = vpop.eup %3430 }
 0x123   :  { %v3433_v53 = vpop.eup %3432  ;;  %v375_v54 = vmul.f32 %v3431_v51, %v3429_v50  ;;  %v703_v50 = vld [vmem:[#allocation2 + $0x16] sm:$0x3] }
 0x124   :  { %v374_v55 = vmul.f32 0.0, %v3433_v53 }
 0x126   :  { %v3790_v56 = vadd.f32 %v375_v54, %v374_v55 }
 0x128   :  { %3436 = vtanh.f32 %v3790_v56 }
 0x12b   :  { %v3435_v57 = vpop.eup %3434 }
 0x132   :  { %v3437_v58 = vpop.eup %3436 }
 0x133   :  { %v378_v59 = vmul.f32 %v3437_v58, %v3435_v57 }
 0x135   :  { %2919 = vmatmul.mubr.msk.f32.vlgmr.msra.gmra.mrb[4].mxu0 %vm67_vm1, %v378_v59  ;;  %2930 = vmatmul.mubr.msk.f32.vlgmr.msra.gmra.mrb[4].mxu1 %vm67_vm1, %v378_v59  ;;  %380 = vst.msk [vmem:[#allocation7] sm:$0x3] %vm379_vm2, %v378_v59 }
 0x136   :  { %3256 = vmatpush3.bf16.msra.mxu0 %v3751_v18  ;;  %3262 = vmatpush3.bf16.msra.mxu1 %v3755_v19 }
 0x137   :  { %3257 = vmatprep.subr.bf16.mxu0 %v3674_v0  ;;  %3263 = vmatprep.subr.bf16.mxu1 %v3674_v0 }
 0x138   :  { %2940 = vmatprep.mubr.msk.f32.mxu0 %vm3675_vm0, %v3676_v1  ;;  %2951 = vmatprep.mubr.msk.f32.mxu1 %vm3675_vm0, %v3676_v1 }
 0x13a   :  { %3259 = vmatpush3.bf16.msra.mxu0 %v3761_v24  ;;  %3265 = vmatpush3.bf16.msra.mxu1 %v3765_v25 }
 0x13b   :  { %3266 = vmatprep.subr.bf16.mxu0 %v3674_v0  ;;  %3272 = vmatprep.subr.bf16.mxu1 %v3674_v0 }
 0x13d   :  { %2941 = vmatmul.mubr.msk.f32.vlgmr.msra.gmra.mrb[6].mxu0 %vm67_vm1, %v378_v59  ;;  %2952 = vmatmul.mubr.msk.f32.vlgmr.msra.gmra.mrb[6].mxu1 %vm67_vm1, %v378_v59 }
 0x13e   :  { %3268 = vmatpush3.bf16.msra.mxu0 %v3738_v5  ;;  %3274 = vmatpush3.bf16.msra.mxu1 %v3740_v9 }
 0x13f   :  { %3269 = vmatprep.subr.bf16.mxu0 %v3674_v0  ;;  %3275 = vmatprep.subr.bf16.mxu1 %v3674_v0 }
 0x140   :  { %2962 = vmatprep.mubr.msk.f32.mxu0 %vm3675_vm0, %v3676_v1  ;;  %2973 = vmatprep.mubr.msk.f32.mxu1 %vm3675_vm0, %v3676_v1 }
 0x142   :  { %3271 = vmatpush3.bf16.msra.mxu0 %v3743_v12  ;;  %3277 = vmatpush3.bf16.msra.mxu1 %v3747_v13 }
 0x143   :  { %3278 = vmatprep.subr.bf16.mxu0 %v3674_v0  ;;  %3284 = vmatprep.subr.bf16.mxu1 %v3674_v0 }
 0x208   :  { %v455_v62 = vpop.f32.mrb[4].mxu0  ;;  %v532_v63 = vpop.f32.mrb[4].mxu1 }
 0x209   :  { %v459_v2 = vadd.f32 %v455_v62, %v382_v60  ;;  %v536_v3 = vadd.f32 %v532_v63, %v383_v61  ;;  %v2920_v4 = vpop.f32.mrb[5].mxu0  ;;  %v2931_v6 = vpop.f32.mrb[5].mxu1 }
 0x20b   :  { %v2658_v7 = vmul.f32 -1.442695, %v459_v2  ;;  %v2660_v8 = vmul.f32 -1.442695, %v536_v3 }
 0x20d   :  { %3438 = vpow2.f32 %v2658_v7 }
 0x20e   :  { %3440 = vpow2.f32 %v2660_v8 }
 0x210   :  { %v609_v11 = vpop.f32.mrb[6].mxu0  ;;  %v681_v14 = vpop.f32.mrb[6].mxu1 }
 0x211   :  { %v685_v15 = vadd.f32 %v681_v14, %v385_v10  ;;  %v2942_v16 = vpop.f32.mrb[7].mxu0  ;;  %v2953_v17 = vpop.f32.mrb[7].mxu1  ;;  %v613_v22 = vadd.f32 %v609_v11, %v384_v20 }
 0x212   :  { %v1018_v16 = vld [vmem:[#allocation2 + $0x18] sm:$0x3]  ;;  %v1019_v17 = vld [vmem:[#allocation2 + $0x1a] sm:$0x3] }
 0x213   :  { %v2663_v21 = vmul.f32 -1.442695, %v685_v15 }
 0x215   :  { %3442 = vpow2.f32 %v2663_v21 }
 0x216   :  { %3444 = vtanh.f32 %v613_v22 }
 0x217   :  { %v3439_v23 = vpop.eup %3438 }
 0x218   :  { %v3441_v26 = vpop.eup %3440  ;;  %v463_v27 = vadd.f32 1.0, %v3439_v23 }
 0x219   :  { %v540_v28 = vadd.f32 1.0, %v3441_v26 }
 0x21a   :  { %3446 = vrcp.f32 %v463_v27 }
 0x21b   :  { %3448 = vrcp.f32 %v540_v28 }
 0x21f   :  { %v3443_v29 = vpop.eup %3442 }
 0x220   :  { %v3445_v30 = vpop.eup %3444  ;;  %v689_v34 = vadd.f32 1.0, %v3443_v29 }
 0x222   :  { %3450 = vrcp.f32 %v689_v34 }
 0x224   :  { %v3447_v31 = vpop.eup %3446 }
 0x225   :  { %v3449_v32 = vpop.eup %3448  ;;  %v693_v33 = vmul.f32 %v3447_v31, %v3445_v30  ;;  %v1021_v30 = vld [vmem:[#allocation2 + $0x1e] sm:$0x3] }
 0x226   :  { %v692_v35 = vmul.f32 %v3449_v32, %v3790_v56  ;;  %v702_v56 = vld [vmem:[#allocation2 + $0x14] sm:$0x3] }
 0x228   :  { %v3823_v36 = vadd.f32 %v693_v33, %v692_v35 }
 0x22a   :  { %3452 = vtanh.f32 %v3823_v36 }
 0x22c   :  { %v3451_v37 = vpop.eup %3450 }
 0x234   :  { %v3453_v38 = vpop.eup %3452 }
 0x235   :  { %v696_v39 = vmul.f32 %v3453_v38, %v3451_v37 }
 0x237   :  { %2963 = vmatmul.mubr.msk.f32.vlgmr.msra.gmra.mrb[8].mxu0 %vm67_vm1, %v696_v39  ;;  %2974 = vmatmul.mubr.msk.f32.vlgmr.msra.gmra.mrb[8].mxu1 %vm67_vm1, %v696_v39  ;;  %698 = vst.msk [vmem:[#allocation7 + $0x2] sm:$0x3] %vm379_vm2, %v696_v39 }
 0x238   :  { %3280 = vmatpush3.bf16.msra.mxu0 %v3751_v18  ;;  %3286 = vmatpush3.bf16.msra.mxu1 %v3755_v19 }
 0x239   :  { %3281 = vmatprep.subr.bf16.mxu0 %v3674_v0  ;;  %3287 = vmatprep.subr.bf16.mxu1 %v3674_v0 }
 0x23a   :  { %2984 = vmatprep.mubr.msk.f32.mxu0 %vm3675_vm0, %v3676_v1  ;;  %2995 = vmatprep.mubr.msk.f32.mxu1 %vm3675_vm0, %v3676_v1 }
 0x23c   :  { %3283 = vmatpush3.bf16.msra.mxu0 %v3761_v24  ;;  %3289 = vmatpush3.bf16.msra.mxu1 %v3765_v25 }
 0x23d   :  { %3290 = vmatprep.subr.bf16.mxu0 %v3674_v0  ;;  %3296 = vmatprep.subr.bf16.mxu1 %v3674_v0 }
 0x23f   :  { %2985 = vmatmul.mubr.msk.f32.vlgmr.msra.gmra.mrb[10].mxu0 %vm67_vm1, %v696_v39  ;;  %2996 = vmatmul.mubr.msk.f32.vlgmr.msra.gmra.mrb[10].mxu1 %vm67_vm1, %v696_v39 }
 0x240   :  { %3292 = vmatpush3.bf16.msra.mxu0 %v3738_v5  ;;  %3298 = vmatpush3.bf16.msra.mxu1 %v3740_v9 }
 0x241   :  { %3293 = vmatprep.subr.bf16.mxu0 %v3674_v0  ;;  %3299 = vmatprep.subr.bf16.mxu1 %v3674_v0 }
 0x242   :  { %3006 = vmatprep.mubr.msk.f32.mxu0 %vm3675_vm0, %v3676_v1  ;;  %3017 = vmatprep.mubr.msk.f32.mxu1 %vm3675_vm0, %v3676_v1 }
 0x244   :  { %3295 = vmatpush3.bf16.msra.mxu0 %v3743_v12  ;;  %3301 = vmatpush3.bf16.msra.mxu1 %v3747_v13 }
 0x245   :  { %3302 = vmatprep.subr.bf16.mxu0 %v3674_v0  ;;  %3308 = vmatprep.subr.bf16.mxu1 %v3674_v0 }
 0x30a   :  { %v773_v42 = vpop.f32.mrb[8].mxu0  ;;  %v850_v43 = vpop.f32.mrb[8].mxu1 }
 0x30b   :  { %v777_v44 = vadd.f32 %v773_v42, %v700_v40  ;;  %v854_v45 = vadd.f32 %v850_v43, %v701_v41  ;;  %v2964_v46 = vpop.f32.mrb[9].mxu0  ;;  %v2975_v47 = vpop.f32.mrb[9].mxu1 }
 0x30d   :  { %v2665_v48 = vmul.f32 -1.442695, %v777_v44  ;;  %v2667_v49 = vmul.f32 -1.442695, %v854_v45 }
 0x30f   :  { %3454 = vpow2.f32 %v2665_v48 }
 0x310   :  { %3456 = vpow2.f32 %v2667_v49 }
 0x312   :  { %v927_v51 = vpop.f32.mrb[10].mxu0  ;;  %v999_v52 = vpop.f32.mrb[10].mxu1 }
 0x313   :  { %v1003_v53 = vadd.f32 %v999_v52, %v703_v50  ;;  %v2986_v54 = vpop.f32.mrb[11].mxu0  ;;  %v2997_v55 = vpop.f32.mrb[11].mxu1  ;;  %v931_v58 = vadd.f32 %v927_v51, %v702_v56 }
 0x314   :  { %v1336_v54 = vld [vmem:[#allocation2 + $0x20] sm:$0x3]  ;;  %v1337_v55 = vld [vmem:[#allocation2 + $0x22] sm:$0x3] }
 0x315   :  { %v2670_v57 = vmul.f32 -1.442695, %v1003_v53 }
 0x317   :  { %3458 = vpow2.f32 %v2670_v57 }
 0x318   :  { %3460 = vtanh.f32 %v931_v58 }
 0x319   :  { %v3455_v59 = vpop.eup %3454 }
 0x31a   :  { %v3457_v60 = vpop.eup %3456  ;;  %v781_v61 = vadd.f32 1.0, %v3455_v59 }
 0x31b   :  { %v858_v62 = vadd.f32 1.0, %v3457_v60 }
 0x31c   :  { %3462 = vrcp.f32 %v781_v61 }
 0x31d   :  { %3464 = vrcp.f32 %v858_v62 }
 0x321   :  { %v3459_v63 = vpop.eup %3458 }
 0x322   :  { %v3461_v2 = vpop.eup %3460  ;;  %v1007_v7 = vadd.f32 1.0, %v3459_v63 }
 0x324   :  { %3466 = vrcp.f32 %v1007_v7 }
 0x326   :  { %v3463_v3 = vpop.eup %3462 }
 0x327   :  { %v3465_v4 = vpop.eup %3464  ;;  %v1011_v6 = vmul.f32 %v3463_v3, %v3461_v2  ;;  %v1339_v2 = vld [vmem:[#allocation2 + $0x26] sm:$0x3] }
 0x328   :  { %v1010_v8 = vmul.f32 %v3465_v4, %v3823_v36  ;;  %v1020_v36 = vld [vmem:[#allocation2 + $0x1c] sm:$0x3] }
 0x32a   :  { %v3856_v10 = vadd.f32 %v1011_v6, %v1010_v8 }
 0x32c   :  { %3468 = vtanh.f32 %v3856_v10 }
 0x32e   :  { %v3467_v11 = vpop.eup %3466 }
 0x336   :  { %v3469_v14 = vpop.eup %3468 }
 0x337   :  { %v1014_v15 = vmul.f32 %v3469_v14, %v3467_v11 }
 0x339   :  { %3007 = vmatmul.mubr.msk.f32.vlgmr.msra.gmra.mrb[12].mxu0 %vm67_vm1, %v1014_v15  ;;  %3018 = vmatmul.mubr.msk.f32.vlgmr.msra.gmra.mrb[12].mxu1 %vm67_vm1, %v1014_v15  ;;  %1016 = vst.msk [vmem:[#allocation7 + $0x4] sm:$0x3] %vm379_vm2, %v1014_v15 }
 0x33a   :  { %3304 = vmatpush3.bf16.msra.mxu0 %v3751_v18  ;;  %3310 = vmatpush3.bf16.msra.mxu1 %v3755_v19 }
 0x33b   :  { %3305 = vmatprep.subr.bf16.mxu0 %v3674_v0  ;;  %3311 = vmatprep.subr.bf16.mxu1 %v3674_v0 }
 0x33c   :  { %3028 = vmatprep.mubr.msk.f32.mxu0 %vm3675_vm0, %v3676_v1  ;;  %3039 = vmatprep.mubr.msk.f32.mxu1 %vm3675_vm0, %v3676_v1 }
 0x33e   :  { %3307 = vmatpush3.bf16.msra.mxu0 %v3761_v24  ;;  %3313 = vmatpush3.bf16.msra.mxu1 %v3765_v25 }
 0x33f   :  { %3314 = vmatprep.subr.bf16.mxu0 %v3674_v0  ;;  %3320 = vmatprep.subr.bf16.mxu1 %v3674_v0 }
 0x341   :  { %3029 = vmatmul.mubr.msk.f32.vlgmr.msra.gmra.mrb[14].mxu0 %vm67_vm1, %v1014_v15  ;;  %3040 = vmatmul.mubr.msk.f32.vlgmr.msra.gmra.mrb[14].mxu1 %vm67_vm1, %v1014_v15 }
 0x342   :  { %3316 = vmatpush3.bf16.msra.mxu0 %v3738_v5  ;;  %3322 = vmatpush3.bf16.msra.mxu1 %v3740_v9 }
 0x343   :  { %3317 = vmatprep.subr.bf16.mxu0 %v3674_v0  ;;  %3323 = vmatprep.subr.bf16.mxu1 %v3674_v0 }
 0x344   :  { %3050 = vmatprep.mubr.msk.f32.mxu0 %vm3675_vm0, %v3676_v1  ;;  %3061 = vmatprep.mubr.msk.f32.mxu1 %vm3675_vm0, %v3676_v1 }
 0x346   :  { %3319 = vmatpush3.bf16.msra.mxu0 %v3743_v12  ;;  %3325 = vmatpush3.bf16.msra.mxu1 %v3747_v13 }
 0x347   :  { %3326 = vmatprep.subr.bf16.mxu0 %v3674_v0  ;;  %3332 = vmatprep.subr.bf16.mxu1 %v3674_v0 }
 0x40c   :  { %v1091_v20 = vpop.f32.mrb[12].mxu0  ;;  %v1168_v21 = vpop.f32.mrb[12].mxu1 }
 0x40d   :  { %v1095_v22 = vadd.f32 %v1091_v20, %v1018_v16  ;;  %v1172_v23 = vadd.f32 %v1168_v21, %v1019_v17  ;;  %v3008_v26 = vpop.f32.mrb[13].mxu0  ;;  %v3019_v27 = vpop.f32.mrb[13].mxu1 }
 0x40f   :  { %v2672_v28 = vmul.f32 -1.442695, %v1095_v22  ;;  %v2674_v29 = vmul.f32 -1.442695, %v1172_v23 }
 0x411   :  { %3470 = vpow2.f32 %v2672_v28 }
 0x412   :  { %3472 = vpow2.f32 %v2674_v29 }
 0x414   :  { %v1245_v31 = vpop.f32.mrb[14].mxu0  ;;  %v1317_v32 = vpop.f32.mrb[14].mxu1 }
 0x415   :  { %v1321_v33 = vadd.f32 %v1317_v32, %v1021_v30  ;;  %v3030_v34 = vpop.f32.mrb[15].mxu0  ;;  %v3041_v35 = vpop.f32.mrb[15].mxu1  ;;  %v1249_v38 = vadd.f32 %v1245_v31, %v1020_v36 }
 0x416   :  { %v1654_v34 = vld [vmem:[#allocation2 + $0x28] sm:$0x3]  ;;  %v1655_v35 = vld [vmem:[#allocation2 + $0x2a] sm:$0x3] }
 0x417   :  { %v2677_v37 = vmul.f32 -1.442695, %v1321_v33 }
 0x419   :  { %3474 = vpow2.f32 %v2677_v37 }
 0x41a   :  { %3476 = vtanh.f32 %v1249_v38 }
 0x41b   :  { %v3471_v39 = vpop.eup %3470 }
 0x41c   :  { %v3473_v40 = vpop.eup %3472  ;;  %v1099_v41 = vadd.f32 1.0, %v3471_v39 }
 0x41d   :  { %v1176_v42 = vadd.f32 1.0, %v3473_v40 }
 0x41e   :  { %3478 = vrcp.f32 %v1099_v41 }
 0x41f   :  { %3480 = vrcp.f32 %v1176_v42 }
 0x423   :  { %v3475_v43 = vpop.eup %3474 }
 0x424   :  { %v3477_v44 = vpop.eup %3476  ;;  %v1325_v48 = vadd.f32 1.0, %v3475_v43 }
 0x426   :  { %3482 = vrcp.f32 %v1325_v48 }
 0x428   :  { %v3479_v45 = vpop.eup %3478 }
 0x429   :  { %v3481_v46 = vpop.eup %3480  ;;  %v1329_v47 = vmul.f32 %v3479_v45, %v3477_v44  ;;  %v1657_v44 = vld [vmem:[#allocation2 + $0x2e] sm:$0x3] }
 0x42a   :  { %v1328_v49 = vmul.f32 %v3481_v46, %v3856_v10  ;;  %v1338_v10 = vld [vmem:[#allocation2 + $0x24] sm:$0x3] }
 0x42c   :  { %v3889_v50 = vadd.f32 %v1329_v47, %v1328_v49 }
 0x42e   :  { %3484 = vtanh.f32 %v3889_v50 }
 0x430   :  { %v3483_v51 = vpop.eup %3482 }
 0x438   :  { %v3485_v52 = vpop.eup %3484 }
 0x439   :  { %v1332_v53 = vmul.f32 %v3485_v52, %v3483_v51 }
 0x43b   :  { %3051 = vmatmul.mubr.msk.f32.vlgmr.msra.gmra.mrb[16].mxu0 %vm67_vm1, %v1332_v53  ;;  %3062 = vmatmul.mubr.msk.f32.vlgmr.msra.gmra.mrb[16].mxu1 %vm67_vm1, %v1332_v53  ;;  %1334 = vst.msk [vmem:[#allocation7 + $0x6] sm:$0x3] %vm379_vm2, %v1332_v53 }
 0x43c   :  { %3328 = vmatpush3.bf16.msra.mxu0 %v3751_v18  ;;  %3334 = vmatpush3.bf16.msra.mxu1 %v3755_v19 }
 0x43d   :  { %3329 = vmatprep.subr.bf16.mxu0 %v3674_v0  ;;  %3335 = vmatprep.subr.bf16.mxu1 %v3674_v0 }
 0x43e   :  { %3072 = vmatprep.mubr.msk.f32.mxu0 %vm3675_vm0, %v3676_v1  ;;  %3083 = vmatprep.mubr.msk.f32.mxu1 %vm3675_vm0, %v3676_v1 }
 0x440   :  { %3331 = vmatpush3.bf16.msra.mxu0 %v3761_v24  ;;  %3337 = vmatpush3.bf16.msra.mxu1 %v3765_v25 }
 0x441   :  { %3338 = vmatprep.subr.bf16.mxu0 %v3674_v0  ;;  %3344 = vmatprep.subr.bf16.mxu1 %v3674_v0 }
 0x443   :  { %3073 = vmatmul.mubr.msk.f32.vlgmr.msra.gmra.mrb[18].mxu0 %vm67_vm1, %v1332_v53  ;;  %3084 = vmatmul.mubr.msk.f32.vlgmr.msra.gmra.mrb[18].mxu1 %vm67_vm1, %v1332_v53 }
 0x444   :  { %3340 = vmatpush3.bf16.msra.mxu0 %v3738_v5  ;;  %3346 = vmatpush3.bf16.msra.mxu1 %v3740_v9 }
 0x445   :  { %3341 = vmatprep.subr.bf16.mxu0 %v3674_v0  ;;  %3347 = vmatprep.subr.bf16.mxu1 %v3674_v0 }
 0x446   :  { %3094 = vmatprep.mubr.msk.f32.mxu0 %vm3675_vm0, %v3676_v1  ;;  %3105 = vmatprep.mubr.msk.f32.mxu1 %vm3675_vm0, %v3676_v1 }
 0x448   :  { %3343 = vmatpush3.bf16.msra.mxu0 %v3743_v12  ;;  %3349 = vmatpush3.bf16.msra.mxu1 %v3747_v13 }
 0x449   :  { %3350 = vmatprep.subr.bf16.mxu0 %v3674_v0  ;;  %3356 = vmatprep.subr.bf16.mxu1 %v3674_v0 }
 0x50e   :  { %v1409_v56 = vpop.f32.mrb[16].mxu0  ;;  %v1486_v57 = vpop.f32.mrb[16].mxu1 }
 0x50f   :  { %v1413_v58 = vadd.f32 %v1409_v56, %v1336_v54  ;;  %v1490_v59 = vadd.f32 %v1486_v57, %v1337_v55  ;;  %v3052_v60 = vpop.f32.mrb[17].mxu0  ;;  %v3063_v61 = vpop.f32.mrb[17].mxu1 }
 0x511   :  { %v2679_v62 = vmul.f32 -1.442695, %v1413_v58  ;;  %v2681_v63 = vmul.f32 -1.442695, %v1490_v59 }
 0x513   :  { %3486 = vpow2.f32 %v2679_v62 }
 0x514   :  { %3488 = vpow2.f32 %v2681_v63 }
 0x516   :  { %v1563_v3 = vpop.f32.mrb[18].mxu0  ;;  %v1635_v4 = vpop.f32.mrb[18].mxu1 }
 0x517   :  { %v1639_v6 = vadd.f32 %v1635_v4, %v1339_v2  ;;  %v3074_v7 = vpop.f32.mrb[19].mxu0  ;;  %v3085_v8 = vpop.f32.mrb[19].mxu1  ;;  %v1567_v14 = vadd.f32 %v1563_v3, %v1338_v10 }
 0x519   :  { %v2684_v11 = vmul.f32 -1.442695, %v1639_v6 }
 0x51b   :  { %3490 = vpow2.f32 %v2684_v11 }
 0x51c   :  { %3492 = vtanh.f32 %v1567_v14 }
 0x51d   :  { %v3487_v15 = vpop.eup %3486 }
 0x51e   :  { %v3489_v16 = vpop.eup %3488  ;;  %v1417_v17 = vadd.f32 1.0, %v3487_v15 }
 0x51f   :  { %v1494_v20 = vadd.f32 1.0, %v3489_v16 }
 0x520   :  { %3494 = vrcp.f32 %v1417_v17 }
 0x521   :  { %3496 = vrcp.f32 %v1494_v20  ;;  %v1975_v20 = vld [vmem:[#allocation2 + $0x36] sm:$0x3] }
 0x525   :  { %v3491_v21 = vpop.eup %3490 }
 0x526   :  { %v3493_v22 = vpop.eup %3492  ;;  %v1643_v28 = vadd.f32 1.0, %v3491_v21 }
 0x528   :  { %3498 = vrcp.f32 %v1643_v28 }
 0x52a   :  { %v3495_v23 = vpop.eup %3494 }
 0x52b   :  { %v3497_v26 = vpop.eup %3496  ;;  %v1647_v27 = vmul.f32 %v3495_v23, %v3493_v22 }
 0x52c   :  { %v1646_v29 = vmul.f32 %v3497_v26, %v3889_v50  ;;  %v1656_v50 = vld [vmem:[#allocation2 + $0x2c] sm:$0x3]  ;;  %v1974_v26 = vld [vmem:[#allocation2 + $0x34] sm:$0x3] }
 0x52e   :  { %v3922_v30 = vadd.f32 %v1647_v27, %v1646_v29 }
 0x530   :  { %3500 = vtanh.f32 %v3922_v30 }
 0x532   :  { %v3499_v31 = vpop.eup %3498 }
 0x53a   :  { %v3501_v32 = vpop.eup %3500 }
 0x53b   :  { %v1650_v33 = vmul.f32 %v3501_v32, %v3499_v31 }
 0x53d   :  { %3095 = vmatmul.mubr.msk.f32.vlgmr.msra.gmra.mrb[20].mxu0 %vm67_vm1, %v1650_v33  ;;  %3106 = vmatmul.mubr.msk.f32.vlgmr.msra.gmra.mrb[20].mxu1 %vm67_vm1, %v1650_v33  ;;  %1652 = vst.msk [vmem:[#allocation7 + $0x8] sm:$0x3] %vm379_vm2, %v1650_v33 }
 0x53e   :  { %3352 = vmatpush3.bf16.msra.mxu0 %v3751_v18  ;;  %3358 = vmatpush3.bf16.msra.mxu1 %v3755_v19 }
 0x53f   :  { %3353 = vmatprep.subr.bf16.mxu0 %v3674_v0  ;;  %3359 = vmatprep.subr.bf16.mxu1 %v3674_v0 }
 0x540   :  { %3116 = vmatprep.mubr.msk.f32.mxu0 %vm3675_vm0, %v3676_v1  ;;  %3127 = vmatprep.mubr.msk.f32.mxu1 %vm3675_vm0, %v3676_v1 }
 0x542   :  { %3355 = vmatpush3.bf16.msra.mxu0 %v3761_v24  ;;  %3361 = vmatpush3.bf16.msra.mxu1 %v3765_v25 }
 0x543   :  { %3362 = vmatprep.subr.bf16.mxu0 %v3674_v0  ;;  %3368 = vmatprep.subr.bf16.mxu1 %v3674_v0 }
 0x545   :  { %3117 = vmatmul.mubr.msk.f32.vlgmr.msra.gmra.mrb[22].mxu0 %vm67_vm1, %v1650_v33  ;;  %3128 = vmatmul.mubr.msk.f32.vlgmr.msra.gmra.mrb[22].mxu1 %vm67_vm1, %v1650_v33 }
 0x546   :  { %3364 = vmatpush3.bf16.msra.mxu0 %v3738_v5  ;;  %3370 = vmatpush3.bf16.msra.mxu1 %v3740_v9 }
 0x547   :  { %3365 = vmatprep.subr.bf16.mxu0 %v3674_v0  ;;  %3371 = vmatprep.subr.bf16.mxu1 %v3674_v0 }
 0x548   :  { %3138 = vmatprep.mubr.msk.f32.mxu0 %vm3675_vm0, %v3676_v1  ;;  %3149 = vmatprep.mubr.msk.f32.mxu1 %vm3675_vm0, %v3676_v1 }
 0x54a   :  { %3367 = vmatpush3.bf16.msra.mxu0 %v3743_v12  ;;  %3373 = vmatpush3.bf16.msra.mxu1 %v3747_v13 }
 0x54b   :  { %3374 = vmatprep.subr.bf16.mxu0 %v3674_v0  ;;  %3380 = vmatprep.subr.bf16.mxu1 %v3674_v0 }
 0x610   :  { %v1727_v36 = vpop.f32.mrb[20].mxu0  ;;  %v1804_v37 = vpop.f32.mrb[20].mxu1 }
 0x611   :  { %v1731_v38 = vadd.f32 %v1727_v36, %v1654_v34  ;;  %v1808_v39 = vadd.f32 %v1804_v37, %v1655_v35  ;;  %v3096_v40 = vpop.f32.mrb[21].mxu0  ;;  %v3107_v41 = vpop.f32.mrb[21].mxu1 }
 0x613   :  { %v2686_v42 = vmul.f32 -1.442695, %v1731_v38  ;;  %v2688_v43 = vmul.f32 -1.442695, %v1808_v39 }
 0x615   :  { %3502 = vpow2.f32 %v2686_v42 }
 0x616   :  { %3504 = vpow2.f32 %v2688_v43 }
 0x618   :  { %v1881_v45 = vpop.f32.mrb[22].mxu0  ;;  %v1953_v46 = vpop.f32.mrb[22].mxu1 }
 0x619   :  { %v1957_v47 = vadd.f32 %v1953_v46, %v1657_v44  ;;  %v3118_v48 = vpop.f32.mrb[23].mxu0  ;;  %v3129_v49 = vpop.f32.mrb[23].mxu1  ;;  %v1885_v52 = vadd.f32 %v1881_v45, %v1656_v50 }
 0x61b   :  { %v2691_v51 = vmul.f32 -1.442695, %v1957_v47 }
 0x61d   :  { %3506 = vpow2.f32 %v2691_v51 }
 0x61e   :  { %3508 = vtanh.f32 %v1885_v52 }
 0x61f   :  { %v3503_v53 = vpop.eup %3502 }
 0x620   :  { %v3505_v54 = vpop.eup %3504  ;;  %v1735_v55 = vadd.f32 1.0, %v3503_v53 }
 0x621   :  { %v1812_v56 = vadd.f32 1.0, %v3505_v54  ;;  %v2292_v54 = vld [vmem:[#allocation2 + $0x3c] sm:$0x3] }
 0x622   :  { %3510 = vrcp.f32 %v1735_v55 }
 0x623   :  { %3512 = vrcp.f32 %v1812_v56 }
 0x627   :  { %v3507_v57 = vpop.eup %3506 }
 0x628   :  { %v3509_v58 = vpop.eup %3508  ;;  %v1961_v62 = vadd.f32 1.0, %v3507_v57 }
 0x62a   :  { %3514 = vrcp.f32 %v1961_v62 }
 0x62c   :  { %v3511_v59 = vpop.eup %3510 }
 0x62d   :  { %v3513_v60 = vpop.eup %3512  ;;  %v1965_v61 = vmul.f32 %v3511_v59, %v3509_v58 }
 0x62e   :  { %v1964_v63 = vmul.f32 %v3513_v60, %v3922_v30 }
 0x630   :  { %v3955_v2 = vadd.f32 %v1965_v61, %v1964_v63 }
 0x632   :  { %3516 = vtanh.f32 %v3955_v2 }
 0x634   :  { %v3515_v3 = vpop.eup %3514 }
 0x63c   :  { %v3517_v4 = vpop.eup %3516 }
 0x63d   :  { %v1968_v6 = vmul.f32 %v3517_v4, %v3515_v3 }
 0x63f   :  { %3139 = vmatmul.mubr.msk.f32.vlgmr.msra.gmra.mrb[24].mxu0 %vm67_vm1, %v1968_v6  ;;  %3150 = vmatmul.mubr.msk.f32.vlgmr.msra.gmra.mrb[24].mxu1 %vm67_vm1, %v1968_v6  ;;  %1970 = vst.msk [vmem:[#allocation7 + $0xa] sm:$0x3] %vm379_vm2, %v1968_v6 }
 0x640   :  { %3376 = vmatpush3.bf16.msra.mxu0 %v3751_v18  ;;  %3382 = vmatpush3.bf16.msra.mxu1 %v3755_v19 }
 0x641   :  { %3377 = vmatprep.subr.bf16.mxu0 %v3674_v0  ;;  %3383 = vmatprep.subr.bf16.mxu1 %v3674_v0 }
 0x642   :  { %3160 = vmatprep.mubr.msk.f32.mxu0 %vm3675_vm0, %v3676_v1  ;;  %3171 = vmatprep.mubr.msk.f32.mxu1 %vm3675_vm0, %v3676_v1 }
 0x644   :  { %3379 = vmatpush3.bf16.msra.mxu0 %v3761_v24  ;;  %3385 = vmatpush3.bf16.msra.mxu1 %v3765_v25 }
 0x645   :  { %3386 = vmatprep.subr.bf16.mxu0 %v3674_v0  ;;  %3392 = vmatprep.subr.bf16.mxu1 %v3674_v0 }
 0x647   :  { %3161 = vmatmul.mubr.msk.f32.vlgmr.msra.gmra.mrb[26].mxu0 %vm67_vm1, %v1968_v6  ;;  %3172 = vmatmul.mubr.msk.f32.vlgmr.msra.gmra.mrb[26].mxu1 %vm67_vm1, %v1968_v6 }
 0x648   :  { %3388 = vmatpush3.bf16.msra.mxu0 %v3738_v5  ;;  %3394 = vmatpush3.bf16.msra.mxu1 %v3740_v9  ;;  %v1972_v5 = vld [vmem:[#allocation2 + $0x30] sm:$0x3]  ;;  %v1973_v9 = vld [vmem:[#allocation2 + $0x32] sm:$0x3] }
 0x649   :  { %3389 = vmatprep.subr.bf16.mxu0 %v3674_v0  ;;  %3395 = vmatprep.subr.bf16.mxu1 %v3674_v0 }
 0x64a   :  { %3182 = vmatprep.mubr.msk.f32.mxu0 %vm3675_vm0, %v3676_v1  ;;  %3193 = vmatprep.mubr.msk.f32.mxu1 %vm3675_vm0, %v3676_v1 }
 0x64c   :  { %3391 = vmatpush3.bf16.msra.mxu0 %v3743_v12  ;;  %3397 = vmatpush3.bf16.msra.mxu1 %v3747_v13 }
 0x64d   :  { %3398 = vmatprep.subr.bf16.mxu0 %v3674_v0  ;;  %3404 = vmatprep.subr.bf16.mxu1 %v3674_v0 }
 0x712   :  { %v2045_v7 = vpop.f32.mrb[24].mxu0  ;;  %v2122_v8 = vpop.f32.mrb[24].mxu1 }
 0x713   :  { %v2049_v10 = vadd.f32 %v2045_v7, %v1972_v5  ;;  %v2126_v11 = vadd.f32 %v2122_v8, %v1973_v9  ;;  %v3140_v14 = vpop.f32.mrb[25].mxu0  ;;  %v3151_v15 = vpop.f32.mrb[25].mxu1 }
 0x715   :  { %v2693_v16 = vmul.f32 -1.442695, %v2049_v10  ;;  %v2695_v17 = vmul.f32 -1.442695, %v2126_v11 }
 0x717   :  { %3518 = vpow2.f32 %v2693_v16 }
 0x718   :  { %3520 = vpow2.f32 %v2695_v17 }
 0x71a   :  { %v2199_v12 = vpop.f32.mrb[26].mxu0  ;;  %v2271_v21 = vpop.f32.mrb[26].mxu1 }
 0x71b   :  { %v2275_v13 = vadd.f32 %v2271_v21, %v1975_v20  ;;  %v3162_v22 = vpop.f32.mrb[27].mxu0  ;;  %v3173_v23 = vpop.f32.mrb[27].mxu1  ;;  %v2203_v28 = vadd.f32 %v2199_v12, %v1974_v26 }
 0x71d   :  { %v2698_v27 = vmul.f32 -1.442695, %v2275_v13 }
 0x71f   :  { %3522 = vpow2.f32 %v2698_v27 }
 0x720   :  { %3524 = vtanh.f32 %v2203_v28 }
 0x721   :  { %v3519_v29 = vpop.eup %3518 }
 0x722   :  { %v3521_v30 = vpop.eup %3520  ;;  %v2053_v31 = vadd.f32 1.0, %v3519_v29 }
 0x723   :  { %v2130_v32 = vadd.f32 1.0, %v3521_v30 }
 0x724   :  { %3526 = vrcp.f32 %v2053_v31 }
 0x725   :  { %3528 = vrcp.f32 %v2130_v32 }
 0x729   :  { %v3523_v33 = vpop.eup %3522 }
 0x72a   :  { %v3525_v34 = vpop.eup %3524  ;;  %v2279_v38 = vadd.f32 1.0, %v3523_v33 }
 0x72c   :  { %3530 = vrcp.f32 %v2279_v38 }
 0x72e   :  { %v3527_v35 = vpop.eup %3526 }
 0x72f   :  { %v3529_v36 = vpop.eup %3528  ;;  %v2283_v37 = vmul.f32 %v3527_v35, %v3525_v34 }
 0x730   :  { %v2282_v39 = vmul.f32 %v3529_v36, %v3955_v2 }
 0x732   :  { %v2284_v40 = vadd.f32 %v2283_v37, %v2282_v39 }
 0x734   :  { %3532 = vtanh.f32 %v2284_v40 }
 0x736   :  { %v3531_v41 = vpop.eup %3530 }
 0x73e   :  { %v3533_v42 = vpop.eup %3532 }
 0x73f   :  { %v2286_v43 = vmul.f32 %v3533_v42, %v3531_v41 }
 0x741   :  { %3183 = vmatmul.mubr.msk.f32.vlgmr.msra.gmra.mrb[28].mxu0 %vm67_vm1, %v2286_v43  ;;  %3194 = vmatmul.mubr.msk.f32.vlgmr.msra.gmra.mrb[28].mxu1 %vm67_vm1, %v2286_v43  ;;  %2288 = vst.msk [vmem:[#allocation7 + $0xc] sm:$0x3] %vm379_vm2, %v2286_v43 }
 0x742   :  { %3400 = vmatpush3.bf16.msra.mxu0 %v3751_v18  ;;  %3406 = vmatpush3.bf16.msra.mxu1 %v3755_v19  ;;  %v2290_v18 = vld [vmem:[#allocation2 + $0x38] sm:$0x3]  ;;  %v2291_v19 = vld [vmem:[#allocation2 + $0x3a] sm:$0x3] }
 0x743   :  { %3401 = vmatprep.subr.bf16.mxu0 %v3674_v0  ;;  %3407 = vmatprep.subr.bf16.mxu1 %v3674_v0 }
 0x744   :  { %3204 = vmatprep.mubr.msk.f32.mxu0 %vm3675_vm0, %v3676_v1  ;;  %3215 = vmatprep.mubr.msk.f32.mxu1 %vm3675_vm0, %v3676_v1  ;;  %v2293_v1 = vld [vmem:[#allocation2 + $0x3e] sm:$0x3] }
 0x746   :  { %3403 = vmatpush3.bf16.msra.mxu0 %v3761_v24  ;;  %3409 = vmatpush3.bf16.msra.mxu1 %v3765_v25 }
 0x749   :  { %3205 = vmatmul.mubr.msk.f32.vlgmr.msra.gmra.mrb[30].mxu0 %vm67_vm1, %v2286_v43  ;;  %3216 = vmatmul.mubr.msk.f32.vlgmr.msra.gmra.mrb[30].mxu1 %vm67_vm1, %v2286_v43 }
 0x814   :  { %v2363_v44 = vpop.f32.mrb[28].mxu0  ;;  %v2440_v45 = vpop.f32.mrb[28].mxu1 }
 0x815   :  { %v2367_v46 = vadd.f32 %v2363_v44, %v2290_v18  ;;  %v2444_v0 = vadd.f32 %v2440_v45, %v2291_v19  ;;  %v3184_v47 = vpop.f32.mrb[29].mxu0  ;;  %v3195_v48 = vpop.f32.mrb[29].mxu1 }
 0x817   :  { %v2700_v49 = vmul.f32 -1.442695, %v2367_v46  ;;  %v2702_v50 = vmul.f32 -1.442695, %v2444_v0 }
 0x819   :  { %3534 = vpow2.f32 %v2700_v49 }
 0x81a   :  { %3536 = vpow2.f32 %v2702_v50 }
 0x81c   :  { %v2517_v24 = vpop.f32.mrb[30].mxu0  ;;  %v2589_v51 = vpop.f32.mrb[30].mxu1 }
 0x81d   :  { %v2593_v25 = vadd.f32 %v2589_v51, %v2293_v1  ;;  %v3206_v52 = vpop.f32.mrb[31].mxu0  ;;  %v3217_v53 = vpop.f32.mrb[31].mxu1  ;;  %v2521_v56 = vadd.f32 %v2517_v24, %v2292_v54 }
 0x81f   :  { %v2705_v55 = vmul.f32 -1.442695, %v2593_v25 }
 0x821   :  { %3538 = vpow2.f32 %v2705_v55 }
 0x822   :  { %3540 = vtanh.f32 %v2521_v56 }
 0x823   :  { %v3535_v57 = vpop.eup %3534 }
 0x824   :  { %v3537_v58 = vpop.eup %3536  ;;  %v2371_v59 = vadd.f32 1.0, %v3535_v57 }
 0x825   :  { %v2448_v60 = vadd.f32 1.0, %v3537_v58 }
 0x826   :  { %3542 = vrcp.f32 %v2371_v59 }
 0x827   :  { %3544 = vrcp.f32 %v2448_v60 }
 0x82b   :  { %v3539_v61 = vpop.eup %3538 }
 0x82c   :  { %v3541_v62 = vpop.eup %3540  ;;  %v2597_v4 = vadd.f32 1.0, %v3539_v61 }
 0x82e   :  { %3546 = vrcp.f32 %v2597_v4 }
 0x830   :  { %v3543_v63 = vpop.eup %3542 }
 0x831   :  { %v3545_v2 = vpop.eup %3544  ;;  %v2601_v3 = vmul.f32 %v3543_v63, %v3541_v62 }
 0x832   :  { %v2600_v6 = vmul.f32 %v3545_v2, %v2284_v40 }
 0x834   :  { %v2602_v5 = vadd.f32 %v2601_v3, %v2600_v6 }
 0x836   :  { %3548 = vtanh.f32 %v2602_v5  ;;  %2608 = vst.msk [vmem:[#allocation10] sm:$0x3] %vm379_vm2, %v2602_v5 }
 0x838   :  { %v3547_v9 = vpop.eup %3546 }
 0x840   :  { %v3549_v7 = vpop.eup %3548 }
 0x841   :  { %v2604_v8 = vmul.f32 %v3549_v7, %v3547_v9 }
 0x843   :  { %2606 = vst.msk [vmem:[#allocation7 + $0xe] sm:$0x3] %vm379_vm2, %v2604_v8  ;;  %2607 = vst.msk [vmem:[#allocation8] sm:$0x3] %vm379_vm2, %v2604_v8 }
 0x844   :  { %3605 = shalt.err (!%p3602_p6)
}
 0x845   :  { %s3606_s24 = scalar_lea.hbm %s4062_s3, 32 }
 0x846   :  { %p3607_p7 = scmp.ne.s32.totalorder %s4062_s3, %s3606_s24  ;;  %p3610_p8 = scmp.lt.u32.totalorder %s3606_s24, %s4062_s3 }
 0x848   :  { %p3612_p9 = pnand %p3610_p8, %p3607_p7 }
 0x84a   :  { %3615 = shalt.err (!%p3612_p9)
}
 0x84b   :  { %2630 = dma.vmem_to_hbm [thread:$0]  %s2628_s16, 32, %s4062_s3, [#allocation9]  }
 0x84c   :  { %s3616_s7 = scalar_lea.vmem %s4004_s18, 256  ;;  %p3621_p11 = scmp.lt.s32.totalorder %s4004_s18, %s4004_s18 }
 0x84d   :  { %p3617_p10 = scmp.ne.s32.totalorder %s4004_s18, %s3616_s7  ;;  %p3622_p12 = scmp.lt.s32.totalorder %s3616_s7, %s3616_s7 }
 0x84f   :  { %p3623_p13 = por %p3622_p12, %p3621_p11 }
 0x851   :  { %p3624_p0 = pnand %p3623_p13, %p3617_p10 }
 0x853   :  { %3627 = shalt.err (!%p3624_p0)
}
 0x854   :  { %s3628_s10 = scalar_lea.hbm %s4061_s2, 256 }
 0x855   :  { %p3629_p1 = scmp.ne.s32.totalorder %s4061_s2, %s3628_s10  ;;  %p3632_p2 = scmp.lt.u32.totalorder %s3628_s10, %s4061_s2 }
 0x857   :  { %p3634_p3 = pnand %p3632_p2, %p3629_p1 }
 0x859   :  { %3637 = shalt.err (!%p3634_p3)
}
 0x85a   :  { %2620 = dma.vmem_to_hbm [thread:$0]  %s4004_s18, 256, %s4061_s2, [#allocation4], %s3669_s25, %s3669_s25, %s3670_s26  }
 0x85b   :  { %s3638_s15 = scalar_lea.vmem %s4008_s20, 32  ;;  %p3643_p5 = scmp.lt.s32.totalorder %s4008_s20, %s4008_s20 }
 0x85c   :  { %p3639_p4 = scmp.ne.s32.totalorder %s4008_s20, %s3638_s15  ;;  %p3644_p6 = scmp.lt.s32.totalorder %s3638_s15, %s3638_s15 }
 0x85e   :  { %p3645_p7 = por %p3644_p6, %p3643_p5 }
 0x860   :  { %p3646_p8 = pnand %p3645_p7, %p3639_p4 }
 0x862   :  { %3649 = shalt.err (!%p3646_p8)
}
 0x863   :  { %s3650_s17 = scalar_lea.hbm %s4063_s4, 32 }
 0x864   :  { %p3651_p9 = scmp.ne.s32.totalorder %s4063_s4, %s3650_s17  ;;  %p3654_p10 = scmp.lt.u32.totalorder %s3650_s17, %s4063_s4 }
 0x866   :  { %p3656_p11 = pnand %p3654_p10, %p3651_p9 }
 0x868   :  { %3659 = shalt.err (!%p3656_p11)
}
 0x869   :  { %2640 = dma.vmem_to_hbm [thread:$0]  %s4008_s20, 32, %s4063_s4, [#allocation9]  }
 0x86a   :  { %3664 = dma.done.wait [#allocation4], 256  }
 0x86b   :  { %3665 = vsyncadd [#allocation4], 4294967040 }
 0x86c   :  { %3666 = dma.done.wait [#allocation9], 64  }
 0x86d   :  { %3667 = vsyncadd [#allocation9], 4294967232 }
 0x86e   :  { %2650 = vsyncpa [#allocation3], 1 }
 0x86f   :  { %2651 = vsyncpa [#allocation6], 1 }
 0x870   :  { %2652 = vsyncpa [#allocation4], 1 }
 0x871   :  { %2653 = vsyncpa [#allocation9], 1 }

</bundles_post_ra>
